<compile_context>
chip_gen: v7x
topology: tpu7x:2x2x1
jax: 0.10.0
libtpu: 0.0.40
codegen_flags: <defaults>
</compile_context>

<pallas_src>
import functools
import math

import jax
import jax.numpy as jnp
from jax.experimental import pallas as pl
from jax.experimental.pallas import tpu as pltpu


def _round_up(a, b):
    return ((a + b - 1) // b) * b


def _vmem_budget_bytes():
    """Generation-aware usable-VMEM budget: physical capacity minus headroom."""
    cap = 64 * 1024 * 1024                       # conservative fallback (v7x physical)
    try:
        cap = int(getattr(pltpu.get_tpu_info(), "vmem_capacity_bytes", cap))
    except Exception:
        pass
    return max(cap - 16 * 1024 * 1024, 32 * 1024 * 1024)


def build_scaled_laplacian(edge_index, num_nodes):
    """Dense L_hat = -D^{-1/2} A D^{-1/2} (PyG ChebConv sym norm, lambda_max=2.0)."""
    row, col = edge_index[0], edge_index[1]
    w = jnp.where(row != col, 1.0, 0.0).astype(jnp.float32)     # drop self-loops
    a = jnp.zeros((num_nodes, num_nodes), jnp.float32).at[row, col].add(w)
    deg = a.sum(axis=1)
    dinv = jnp.where(deg > 0, jax.lax.rsqrt(deg), 0.0)
    return -(dinv[:, None] * a * dinv[None, :])


# ---------------------------------------------------------------------------
# Path A (resident): everything (incl. 2*L_hat) fits VMEM -> one fused kernel,
# no grid, recursion unrolled over K, weight matmuls + bias + ELU fused in.
# ---------------------------------------------------------------------------
def kipf_resident_kernel(l2_ref, x_ref, w_ref, b_ref, o_ref, *, K):
    l2 = l2_ref[...]                                     # (N_pad, N_pad) bf16 = 2*L_hat
    tx_pm1 = x_ref[...]                                  # Tx_0, f32
    out = jnp.dot(tx_pm1.astype(jnp.bfloat16), w_ref[0],
                  preferred_element_type=jnp.float32)
    # Tx_1 = L_hat @ x ; the factor 2 is folded into l2, corrected once by 0.5.
    tx_p = 0.5 * jnp.dot(l2, tx_pm1.astype(jnp.bfloat16),
                         preferred_element_type=jnp.float32)
    out = out + jnp.dot(tx_p.astype(jnp.bfloat16), w_ref[1],
                        preferred_element_type=jnp.float32)
    for k in range(2, K):                                # static unroll (K is small)
        tx_k = jnp.dot(l2, tx_p.astype(jnp.bfloat16),
                       preferred_element_type=jnp.float32) - tx_pm1
        out = out + jnp.dot(tx_k.astype(jnp.bfloat16), w_ref[k],
                            preferred_element_type=jnp.float32)
        tx_pm1, tx_p = tx_p, tx_k
    out = out + b_ref[...]
    # ELU(alpha=1): x if x > 0 else exp(x) - 1  (exp arg clamped so the dead lane is finite)
    o_ref[...] = jnp.where(out > 0.0, out, jnp.exp(jnp.minimum(out, 0.0)) - 1.0)


# ---------------------------------------------------------------------------
# Path B (streaming): L does not fit VMEM.  One pallas_call per recursion step,
# Tx carries live in HBM between calls, grid = (row tiles [parallel], L-column
# tiles [arbitrary, reduction last]).  No runtime branching: has_prev / scale
# are Python statics per call.
# ---------------------------------------------------------------------------
def cheb_step_kernel(l2_ref, txc_ref, txp_ref, o_ref, acc_ref, *, has_prev, scale):
    j = pl.program_id(1)

    @pl.when(j == 0)
    def _init():
        acc_ref[...] = jnp.zeros_like(acc_ref)

    acc_ref[...] += jnp.dot(l2_ref[...], txc_ref[...].astype(jnp.bfloat16),
                            preferred_element_type=jnp.float32)

    @pl.when(j == pl.num_programs(1) - 1)
    def _finalize():
        val = acc_ref[...]
        if scale != 1.0:            # static: only the Tx_1 step scales by 0.5
            val = val * scale
        if has_prev:                # static: Tx_1 has no Tx_{-1} term
            val = val - txp_ref[...]
        o_ref[...] = val


def cheb_output_kernel(basis_ref, w_ref, b_ref, o_ref):
    """ELU( [Tx_0|...|Tx_{K-1}] @ W_fused + bias ) for one row tile (lane-dense)."""
    out = jnp.dot(basis_ref[...].astype(jnp.bfloat16), w_ref[...],
                  preferred_element_type=jnp.float32) + b_ref[...]
    o_ref[...] = jnp.where(out > 0.0, out, jnp.exp(jnp.minimum(out, 0.0)) - 1.0)


# ---------------------------------------------------------------------------
# Wrapper
# ---------------------------------------------------------------------------
@functools.partial(jax.jit, static_argnames=("K", "force_path"))
def kipfblock_forward(x, edge_index, weights, bias, *, K, force_path=None):
    """Kipfblock.forward with bn=False: ELU(ChebConv(x, edge_index, K))."""
    assert K >= 2
    assert force_path in (None, "resident", "stream")
    N, F = x.shape
    H = weights.shape[-1]
    F_pad = _round_up(F, 8)
    H_pad = _round_up(H, 128)                   # lane-dense output stores
    lane_f = _round_up(F_pad, 128)              # VMEM lane padding of narrow f32 buffers
    budget = _vmem_budget_bytes()

    bp = jnp.zeros((1, H_pad), jnp.float32).at[0, :H].set(bias)

    # --- resident-path sizing (lane-padding-correct, conservative double-buffer L) ---
    N_res = _round_up(N, 128)
    need_res = (2 * N_res * N_res * 2           # 2*L_hat, bf16
                + 2 * N_res * lane_f * 4        # x, f32
                + 6 * N_res * lane_f * 4        # unrolled-recursion Tx temporaries, f32
                + 2 * N_res * H_pad * 4         # fused output, f32
                + 2 * K * F_pad * H_pad * 2)    # weights, bf16
    use_resident = (force_path == "resident" or
                    (force_path is None and need_res + (4 << 20) <= budget))

    if use_resident:
        N_pad = N_res
        l2 = jnp.zeros((N_pad, N_pad), jnp.float32).at[:N, :N].set(
            2.0 * build_scaled_laplacian(edge_index, N)).astype(jnp.bfloat16)
        xp = jnp.zeros((N_pad, F_pad), jnp.float32).at[:N, :F].set(x)
        wp = (jnp.zeros((K, F_pad, H_pad), jnp.float32)
              .at[:, :F, :H].set(weights).astype(jnp.bfloat16))
        out_pad = pl.pallas_call(
            functools.partial(kipf_resident_kernel, K=K),
            out_shape=jax.ShapeDtypeStruct((N_pad, H_pad), jnp.float32),
            compiler_params=pltpu.CompilerParams(
                vmem_limit_bytes=int(min(budget, max(need_res + (8 << 20), 32 << 20)))),
        )(l2, xp, wp, bp)
        return out_pad[:N, :H]

    # --- streaming fallback: adaptive tiles, N padded only to lcm(tm, tk) ---
    lcm = lambda a, b: a * b // math.gcd(a, b)
    N_unit = _round_up(N, 128)
    tm = min(512, N_unit)
    tk = min(1024, N_unit)
    tk_alt = min(512, N_unit)
    if _round_up(N, lcm(tm, tk)) > _round_up(N, lcm(tm, tk_alt)):
        tk = tk_alt                              # smaller L tile if it saves padding
    N_pad = _round_up(N, lcm(tm, tk))
    n_i, n_j = N_pad // tm, N_pad // tk

    l2 = jnp.zeros((N_pad, N_pad), jnp.float32).at[:N, :N].set(
        2.0 * build_scaled_laplacian(edge_index, N)).astype(jnp.bfloat16)
    xp = jnp.zeros((N_pad, F_pad), jnp.float32).at[:N, :F].set(x)

    step_vmem = int(min(budget,
                        2 * tm * tk * 2                       # L tiles, double-buffered
                        + 2 * (2 * tm + tk) * lane_f * 4      # Tx blocks (in/out)
                        + tm * lane_f * 4                     # accumulator
                        + (8 << 20)))                         # headroom

    def cheb_step(tx_cur, tx_prev, has_prev, scale):
        return pl.pallas_call(
            functools.partial(cheb_step_kernel, has_prev=has_prev, scale=scale),
            out_shape=jax.ShapeDtypeStruct((N_pad, F_pad), jnp.float32),
            grid_spec=pltpu.PrefetchScalarGridSpec(
                num_scalar_prefetch=0,
                grid=(n_i, n_j),                              # reduction axis last
                in_specs=[
                    pl.BlockSpec((tm, tk), lambda i, j: (i, j)),      # 2*L_hat, bf16
                    pl.BlockSpec((tk, F_pad), lambda i, j: (j, 0)),   # Tx_s column tile
                    pl.BlockSpec((tm, F_pad), lambda i, j: (i, 0)),   # Tx_{s-1} row tile
                ],
                out_specs=pl.BlockSpec((tm, F_pad), lambda i, j: (i, 0)),
                scratch_shapes=[pltpu.VMEM((tm, F_pad), jnp.float32)],
            ),
            compiler_params=pltpu.CompilerParams(
                # Tx carries live in HBM between steps -> row tiles are independent
                # ("parallel" -> v7x megacore); the L-column reduction stays arbitrary.
                dimension_semantics=("parallel", "arbitrary"),
                vmem_limit_bytes=step_vmem,
            ),
        )(l2, tx_cur, tx_prev)

    tx_list = [xp]                                            # Tx_0
    tx_p = cheb_step(xp, xp, has_prev=False, scale=0.5)       # Tx_1 (prev arg unused)
    tx_list.append(tx_p)
    tx_pm1 = xp
    for _ in range(2, K):
        tx_k = cheb_step(tx_p, tx_pm1, has_prev=True, scale=1.0)
        tx_list.append(tx_k)
        tx_pm1, tx_p = tx_p, tx_k

    # Contiguous (N_pad, K*F_pad) basis assembled wrapper-side (cheap HBM copy) so the
    # output kernel is a single lane-dense matmul with no in-kernel concatenate.
    basis = jnp.concatenate(tx_list, axis=1)
    wf = (jnp.zeros((K, F_pad, H_pad), jnp.float32)
          .at[:, :F, :H].set(weights).reshape(K * F_pad, H_pad).astype(jnp.bfloat16))

    out_pad = pl.pallas_call(
        cheb_output_kernel,
        out_shape=jax.ShapeDtypeStruct((N_pad, H_pad), jnp.float32),
        grid_spec=pltpu.PrefetchScalarGridSpec(
            num_scalar_prefetch=0,
            grid=(n_i,),
            in_specs=[
                pl.BlockSpec((tm, K * F_pad), lambda i: (i, 0)),
                pl.BlockSpec((K * F_pad, H_pad), lambda i: (0, 0)),
                pl.BlockSpec((1, H_pad), lambda i: (0, 0)),
            ],
            out_specs=pl.BlockSpec((tm, H_pad), lambda i: (i, 0)),
        ),
        compiler_params=pltpu.CompilerParams(
            dimension_semantics=("parallel",),                # independent row tiles
        ),
    )(basis, wf, bp)
    return out_pad[:N, :H]


# ---------------------------------------------------------------------------
# Pure-JAX reference mirroring the kernel's mixed precision: bf16 operands into
# every MXU matmul (propagation and weights), f32 accumulation / carries.
# ---------------------------------------------------------------------------
def kipfblock_reference(x, edge_index, weights, bias, *, K):
    hi = jax.lax.Precision.HIGHEST
    bf = lambda a: a.astype(jnp.bfloat16).astype(jnp.float32)
    N = x.shape[0]
    l2 = bf(2.0 * build_scaled_laplacian(edge_index, N))
    w = bf(weights)
    tx_pm1 = x.astype(jnp.float32)                                  # Tx_0
    out = jnp.dot(bf(tx_pm1), w[0], precision=hi)
    tx_p = 0.5 * jnp.dot(l2, bf(tx_pm1), precision=hi)              # Tx_1
    out = out + jnp.dot(bf(tx_p), w[1], precision=hi)
    for k in range(2, K):
        tx_k = jnp.dot(l2, bf(tx_p), precision=hi) - tx_pm1
        out = out + jnp.dot(bf(tx_k), w[k], precision=hi)
        tx_pm1, tx_p = tx_p, tx_k
    out = out + bias[None, :]
    return jnp.where(out > 0.0, out, jnp.exp(jnp.minimum(out, 0.0)) - 1.0)


if __name__ == "__main__":
    def run_case(n_nodes, n_input, n_hidden, K, n_edges, seed, force_path=None):
        key = jax.random.fold_in(jax.random.PRNGKey(0), seed)
        kx, kw, kb, ke = jax.random.split(key, 4)
        x = jax.random.normal(kx, (n_nodes, n_input), dtype=jnp.float32)
        if n_edges is None:
            # Undirected ring graph, both directions listed (PyG style).
            src = jnp.arange(n_nodes, dtype=jnp.int32)
            dst = (src + 1) % n_nodes
            edge_index = jnp.concatenate(
                [jnp.stack([src, dst]), jnp.stack([dst, src])], axis=1)
        else:
            edge_index = jax.random.randint(ke, (2, n_edges), 0, n_nodes, dtype=jnp.int32)
        scale = (2.0 / (n_input + n_hidden)) ** 0.5
        weights = scale * jax.random.normal(kw, (K, n_input, n_hidden), dtype=jnp.float32)
        bias = 0.1 * jax.random.normal(kb, (n_hidden,), dtype=jnp.float32)

        out = jax.block_until_ready(
            kipfblock_forward(x, edge_index, weights, bias, K=K, force_path=force_path))
        ref = kipfblock_reference(x, edge_index, weights, bias, K=K)
        assert out.shape == (n_nodes, n_hidden)
        err = jnp.max(jnp.abs(out - ref))
        assert jnp.allclose(out, ref, atol=2e-3, rtol=2e-3), f"mismatch, max abs err {err}"

    # Kipfblock-sized toy problem (ring graph): n_input=8, n_hidden=32, K=8.
    # Small N -> fused, fully VMEM-resident single-kernel path.
    run_case(16, 8, 32, 8, None, seed=0)
    # Padding paths (F=6 -> 8, H=20 -> 128) on a random graph, still resident.
    run_case(200, 6, 20, 5, 600, seed=1)
    # Force the large-graph streaming path (per-step calls, tiled bf16 L stream,
    # HBM Tx carries, 'parallel' row axis, fused lane-dense output kernel).
    run_case(1100, 6, 20, 5, 4000, seed=2, force_path="stream")

    print("KERNEL_OK")
</pallas_src>

<mosaic_0001>
module attributes {stable_mosaic.version = 11 : i64} {
  func.func private @main(%arg0: i32) attributes {dimension_semantics = [#tpu.dimension_semantics<core_parallel>], iteration_bounds = array<i64: 2>, tpu.core_type = #tpu.core_type<sc_scalar_subcore>, window_params = []} {
    return
  }
}

module attributes {stable_mosaic.version = 11 : i64} {
  func.func private @main(%arg0: i32) attributes {dimension_semantics = [#tpu.dimension_semantics<core_parallel>], iteration_bounds = array<i64: 2>, tpu.core_type = #tpu.core_type<sc_scalar_subcore>, window_params = []} {
    return
  }
}

module attributes {stable_mosaic.version = 11 : i64} {
  func.func @kipf_resident_kernel(%arg0: memref<128x128xbf16, #tpu.memory_space<vmem>>, %arg1: memref<128x8xf32, #tpu.memory_space<vmem>>, %arg2: memref<8x8x128xbf16, #tpu.memory_space<vmem>>, %arg3: memref<1x128xf32, #tpu.memory_space<vmem>>, %arg4: memref<128x128xf32, #tpu.memory_space<vmem>>) attributes {dimension_semantics = [], scalar_prefetch = 0 : i64, scratch_operands = 0 : i64, tpu.core_type = #tpu.core_type<tc>} {
    %c0 = arith.constant 0 : index
    %c0_0 = arith.constant 0 : index
    %0 = vector.load %arg0[%c0, %c0_0] : memref<128x128xbf16, #tpu.memory_space<vmem>>, vector<128x128xbf16>
    %c0_1 = arith.constant 0 : index
    %c0_2 = arith.constant 0 : index
    %1 = vector.load %arg1[%c0_1, %c0_2] : memref<128x8xf32, #tpu.memory_space<vmem>>, vector<128x8xf32>
    %2 = arith.truncf %1 : vector<128x8xf32> to vector<128x8xbf16>
    %c0_3 = arith.constant 0 : index
    %c0_4 = arith.constant 0 : index
    %c0_5 = arith.constant 0 : index
    %3 = vector.load %arg2[%c0_3, %c0_4, %c0_5] : memref<8x8x128xbf16, #tpu.memory_space<vmem>>, vector<1x8x128xbf16>
    %4 = vector.shape_cast %3 : vector<1x8x128xbf16> to vector<8x128xbf16>
    %cst = arith.constant dense<0.000000e+00> : vector<128x128xf32>
    %5 = tpu.matmul %2, %4, %cst {dimension_numbers = #tpu.dot_dimension_numbers<[1], [0], [0], [1], [0, 0, 1, 1], [], []>} : vector<128x8xbf16>, vector<8x128xbf16>, vector<128x128xf32> -> vector<128x128xf32>
    %6 = arith.truncf %1 : vector<128x8xf32> to vector<128x8xbf16>
    %cst_6 = arith.constant dense<0.000000e+00> : vector<128x8xf32>
    %7 = tpu.matmul %0, %6, %cst_6 {dimension_numbers = #tpu.dot_dimension_numbers<[1], [0], [0], [1], [0, 0, 1, 1], [], []>} : vector<128x128xbf16>, vector<128x8xbf16>, vector<128x8xf32> -> vector<128x8xf32>
    %cst_7 = arith.constant 5.000000e-01 : f32
    %8 = vector.broadcast %cst_7 : f32 to vector<128x8xf32>
    %9 = arith.mulf %8, %7 : vector<128x8xf32>
    %10 = arith.truncf %9 : vector<128x8xf32> to vector<128x8xbf16>
    %c1 = arith.constant 1 : index
    %c0_8 = arith.constant 0 : index
    %c0_9 = arith.constant 0 : index
    %11 = vector.load %arg2[%c1, %c0_8, %c0_9] : memref<8x8x128xbf16, #tpu.memory_space<vmem>>, vector<1x8x128xbf16>
    %12 = vector.shape_cast %11 : vector<1x8x128xbf16> to vector<8x128xbf16>
    %cst_10 = arith.constant dense<0.000000e+00> : vector<128x128xf32>
    %13 = tpu.matmul %10, %12, %cst_10 {dimension_numbers = #tpu.dot_dimension_numbers<[1], [0], [0], [1], [0, 0, 1, 1], [], []>} : vector<128x8xbf16>, vector<8x128xbf16>, vector<128x128xf32> -> vector<128x128xf32>
    %14 = arith.addf %5, %13 : vector<128x128xf32>
    %15 = arith.truncf %9 : vector<128x8xf32> to vector<128x8xbf16>
    %cst_11 = arith.constant dense<0.000000e+00> : vector<128x8xf32>
    %16 = tpu.matmul %0, %15, %cst_11 {dimension_numbers = #tpu.dot_dimension_numbers<[1], [0], [0], [1], [0, 0, 1, 1], [], []>} : vector<128x128xbf16>, vector<128x8xbf16>, vector<128x8xf32> -> vector<128x8xf32>
    %17 = arith.subf %16, %1 : vector<128x8xf32>
    %18 = arith.truncf %17 : vector<128x8xf32> to vector<128x8xbf16>
    %c2 = arith.constant 2 : index
    %c0_12 = arith.constant 0 : index
    %c0_13 = arith.constant 0 : index
    %19 = vector.load %arg2[%c2, %c0_12, %c0_13] : memref<8x8x128xbf16, #tpu.memory_space<vmem>>, vector<1x8x128xbf16>
    %20 = vector.shape_cast %19 : vector<1x8x128xbf16> to vector<8x128xbf16>
    %cst_14 = arith.constant dense<0.000000e+00> : vector<128x128xf32>
    %21 = tpu.matmul %18, %20, %cst_14 {dimension_numbers = #tpu.dot_dimension_numbers<[1], [0], [0], [1], [0, 0, 1, 1], [], []>} : vector<128x8xbf16>, vector<8x128xbf16>, vector<128x128xf32> -> vector<128x128xf32>
    %22 = arith.addf %14, %21 : vector<128x128xf32>
    %23 = arith.truncf %17 : vector<128x8xf32> to vector<128x8xbf16>
    %cst_15 = arith.constant dense<0.000000e+00> : vector<128x8xf32>
    %24 = tpu.matmul %0, %23, %cst_15 {dimension_numbers = #tpu.dot_dimension_numbers<[1], [0], [0], [1], [0, 0, 1, 1], [], []>} : vector<128x128xbf16>, vector<128x8xbf16>, vector<128x8xf32> -> vector<128x8xf32>
    %25 = arith.subf %24, %9 : vector<128x8xf32>
    %26 = arith.truncf %25 : vector<128x8xf32> to vector<128x8xbf16>
    %c3 = arith.constant 3 : index
    %c0_16 = arith.constant 0 : index
    %c0_17 = arith.constant 0 : index
    %27 = vector.load %arg2[%c3, %c0_16, %c0_17] : memref<8x8x128xbf16, #tpu.memory_space<vmem>>, vector<1x8x128xbf16>
    %28 = vector.shape_cast %27 : vector<1x8x128xbf16> to vector<8x128xbf16>
    %cst_18 = arith.constant dense<0.000000e+00> : vector<128x128xf32>
    %29 = tpu.matmul %26, %28, %cst_18 {dimension_numbers = #tpu.dot_dimension_numbers<[1], [0], [0], [1], [0, 0, 1, 1], [], []>} : vector<128x8xbf16>, vector<8x128xbf16>, vector<128x128xf32> -> vector<128x128xf32>
    %30 = arith.addf %22, %29 : vector<128x128xf32>
    %31 = arith.truncf %25 : vector<128x8xf32> to vector<128x8xbf16>
    %cst_19 = arith.constant dense<0.000000e+00> : vector<128x8xf32>
    %32 = tpu.matmul %0, %31, %cst_19 {dimension_numbers = #tpu.dot_dimension_numbers<[1], [0], [0], [1], [0, 0, 1, 1], [], []>} : vector<128x128xbf16>, vector<128x8xbf16>, vector<128x8xf32> -> vector<128x8xf32>
    %33 = arith.subf %32, %17 : vector<128x8xf32>
    %34 = arith.truncf %33 : vector<128x8xf32> to vector<128x8xbf16>
    %c4 = arith.constant 4 : index
    %c0_20 = arith.constant 0 : index
    %c0_21 = arith.constant 0 : index
    %35 = vector.load %arg2[%c4, %c0_20, %c0_21] : memref<8x8x128xbf16, #tpu.memory_space<vmem>>, vector<1x8x128xbf16>
    %36 = vector.shape_cast %35 : vector<1x8x128xbf16> to vector<8x128xbf16>
    %cst_22 = arith.constant dense<0.000000e+00> : vector<128x128xf32>
    %37 = tpu.matmul %34, %36, %cst_22 {dimension_numbers = #tpu.dot_dimension_numbers<[1], [0], [0], [1], [0, 0, 1, 1], [], []>} : vector<128x8xbf16>, vector<8x128xbf16>, vector<128x128xf32> -> vector<128x128xf32>
    %38 = arith.addf %30, %37 : vector<128x128xf32>
    %39 = arith.truncf %33 : vector<128x8xf32> to vector<128x8xbf16>
    %cst_23 = arith.constant dense<0.000000e+00> : vector<128x8xf32>
    %40 = tpu.matmul %0, %39, %cst_23 {dimension_numbers = #tpu.dot_dimension_numbers<[1], [0], [0], [1], [0, 0, 1, 1], [], []>} : vector<128x128xbf16>, vector<128x8xbf16>, vector<128x8xf32> -> vector<128x8xf32>
    %41 = arith.subf %40, %25 : vector<128x8xf32>
    %42 = arith.truncf %41 : vector<128x8xf32> to vector<128x8xbf16>
    %c5 = arith.constant 5 : index
    %c0_24 = arith.constant 0 : index
    %c0_25 = arith.constant 0 : index
    %43 = vector.load %arg2[%c5, %c0_24, %c0_25] : memref<8x8x128xbf16, #tpu.memory_space<vmem>>, vector<1x8x128xbf16>
    %44 = vector.shape_cast %43 : vector<1x8x128xbf16> to vector<8x128xbf16>
    %cst_26 = arith.constant dense<0.000000e+00> : vector<128x128xf32>
    %45 = tpu.matmul %42, %44, %cst_26 {dimension_numbers = #tpu.dot_dimension_numbers<[1], [0], [0], [1], [0, 0, 1, 1], [], []>} : vector<128x8xbf16>, vector<8x128xbf16>, vector<128x128xf32> -> vector<128x128xf32>
    %46 = arith.addf %38, %45 : vector<128x128xf32>
    %47 = arith.truncf %41 : vector<128x8xf32> to vector<128x8xbf16>
    %cst_27 = arith.constant dense<0.000000e+00> : vector<128x8xf32>
    %48 = tpu.matmul %0, %47, %cst_27 {dimension_numbers = #tpu.dot_dimension_numbers<[1], [0], [0], [1], [0, 0, 1, 1], [], []>} : vector<128x128xbf16>, vector<128x8xbf16>, vector<128x8xf32> -> vector<128x8xf32>
    %49 = arith.subf %48, %33 : vector<128x8xf32>
    %50 = arith.truncf %49 : vector<128x8xf32> to vector<128x8xbf16>
    %c6 = arith.constant 6 : index
    %c0_28 = arith.constant 0 : index
    %c0_29 = arith.constant 0 : index
    %51 = vector.load %arg2[%c6, %c0_28, %c0_29] : memref<8x8x128xbf16, #tpu.memory_space<vmem>>, vector<1x8x128xbf16>
    %52 = vector.shape_cast %51 : vector<1x8x128xbf16> to vector<8x128xbf16>
    %cst_30 = arith.constant dense<0.000000e+00> : vector<128x128xf32>
    %53 = tpu.matmul %50, %52, %cst_30 {dimension_numbers = #tpu.dot_dimension_numbers<[1], [0], [0], [1], [0, 0, 1, 1], [], []>} : vector<128x8xbf16>, vector<8x128xbf16>, vector<128x128xf32> -> vector<128x128xf32>
    %54 = arith.addf %46, %53 : vector<128x128xf32>
    %55 = arith.truncf %49 : vector<128x8xf32> to vector<128x8xbf16>
    %cst_31 = arith.constant dense<0.000000e+00> : vector<128x8xf32>
    %56 = tpu.matmul %0, %55, %cst_31 {dimension_numbers = #tpu.dot_dimension_numbers<[1], [0], [0], [1], [0, 0, 1, 1], [], []>} : vector<128x128xbf16>, vector<128x8xbf16>, vector<128x8xf32> -> vector<128x8xf32>
    %57 = arith.subf %56, %41 : vector<128x8xf32>
    %58 = arith.truncf %57 : vector<128x8xf32> to vector<128x8xbf16>
    %c7 = arith.constant 7 : index
    %c0_32 = arith.constant 0 : index
    %c0_33 = arith.constant 0 : index
    %59 = vector.load %arg2[%c7, %c0_32, %c0_33] : memref<8x8x128xbf16, #tpu.memory_space<vmem>>, vector<1x8x128xbf16>
    %60 = vector.shape_cast %59 : vector<1x8x128xbf16> to vector<8x128xbf16>
    %cst_34 = arith.constant dense<0.000000e+00> : vector<128x128xf32>
    %61 = tpu.matmul %58, %60, %cst_34 {dimension_numbers = #tpu.dot_dimension_numbers<[1], [0], [0], [1], [0, 0, 1, 1], [], []>} : vector<128x8xbf16>, vector<8x128xbf16>, vector<128x128xf32> -> vector<128x128xf32>
    %62 = arith.addf %54, %61 : vector<128x128xf32>
    %c0_35 = arith.constant 0 : index
    %c0_36 = arith.constant 0 : index
    %63 = vector.load %arg3[%c0_35, %c0_36] : memref<1x128xf32, #tpu.memory_space<vmem>>, vector<1x128xf32>
    %64 = vector.broadcast %63 : vector<1x128xf32> to vector<128x128xf32>
    %65 = arith.addf %62, %64 : vector<128x128xf32>
    %cst_37 = arith.constant 0.000000e+00 : f32
    %66 = vector.broadcast %cst_37 : f32 to vector<128x128xf32>
    %67 = arith.cmpf ogt, %65, %66 : vector<128x128xf32>
    %cst_38 = arith.constant 0.000000e+00 : f32
    %68 = vector.broadcast %cst_38 : f32 to vector<128x128xf32>
    %69 = arith.minimumf %65, %68 : vector<128x128xf32>
    %70 = math.exp %69 : vector<128x128xf32>
    %cst_39 = arith.constant 1.000000e+00 : f32
    %71 = vector.broadcast %cst_39 : f32 to vector<128x128xf32>
    %72 = arith.subf %70, %71 : vector<128x128xf32>
    %73 = arith.select %67, %65, %72 : vector<128x128xi1>, vector<128x128xf32>
    %c0_40 = arith.constant 0 : index
    %c0_41 = arith.constant 0 : index
    %74 = vector.load %arg4[%c0_40, %c0_41] : memref<128x128xf32, #tpu.memory_space<vmem>>, vector<128x128xf32>
    tpu.vector_store %arg4[%c0_40, %c0_41], %73 {strides = array<i32>} : memref<128x128xf32, #tpu.memory_space<vmem>>, vector<128x128xf32>,
    return
  }
}

</mosaic_0001>

<bundles_post_ra>
// kernel: kipfblock_forward.1
= control target key start
LH: loop header
LB: loop body
LE: loop exit
PB: predicated region body
PF: predicated region fallthrough
CT: control target
= control target key end

     0   :  { %vm255_vm0 = vcmask 1043456   ;;  %vm230_vm1 = vcmask 64512   ;;  %s3833_s1 = inlined_call_operand.vmem [shape: f32[128,8], index: 1, kind: input, shape index: {}]   ;;  %s3834_s0 = inlined_call_operand.vmem [shape: bf16[128,128], index: 0, kind: input, shape index: {}]   ;;  %s3835_s2 = inlined_call_operand.vmem [shape: bf16[8,8,128], index: 2, kind: input, shape index: {}]   ;;  %s3836_s3 = inlined_call_operand.vmem [shape: f32[1,128], index: 3, kind: input, shape index: {}]   ;;  %s3837_s4 = inlined_call_operand.vmem [shape: f32[128,128], index: 4, kind: output, shape index: {}]  }
   0x1   :  { %v3033_v0 = vld [vmem:[%s3833_s1] sm:$0xff]  ;;  %v3038_v1 = vld [vmem:[%s3833_s1 + $0x8] sm:$0xff]  ;;  %v3043_v2 = vld [vmem:[%s3833_s1 + $0x10] sm:$0xff] }
   0x2   :  { %v3047_v3 = vpack.c.bf16 %v3038_v1, %v3033_v0  ;;  %v3052_v4 = vld [vmem:[%s3833_s1 + $0x18] sm:$0xff]  ;;  %v3061_v6 = vld [vmem:[%s3833_s1 + $0x20] sm:$0xff]  ;;  %v3066_v7 = vld [vmem:[%s3833_s1 + $0x28] sm:$0xff] }
   0x3   :  { %v3056_v5 = vpack.c.bf16 %v3052_v4, %v3043_v2  ;;  %v3073_v8 = vld [vmem:[%s3833_s1 + $0x30] sm:$0xff]  ;;  %v3078_v9 = vpack.c.bf16 %v3066_v7, %v3061_v6  ;;  %v3083_v10 = vld [vmem:[%s3833_s1 + $0x38] sm:$0xff]  ;;  %v3088_v11 = vld [vmem:[%s3834_s0] sm:$0xff]  }
   0x4   :  { %2477 = vmatprep.subr.bf16.mxu0 %v3047_v3  ;;  %2493 = vmatprep.mubr.bf16.mxu0 %v3088_v11  ;;  %v3095_v12 = vpack.c.bf16 %v3083_v10, %v3073_v8  ;;  %v3100_v13 = vld [vmem:[%s3833_s1 + $0x40] sm:$0xff]  ;;  %v3105_v14 = vld [vmem:[%s3833_s1 + $0x48] sm:$0xff]  ;;  %v3116_v16 = vld [vmem:[%s3833_s1 + $0x50] sm:$0xff] }
   0x5   :  { %2478 = vmatpush3.bf16.msra.mxu0 %v3047_v3  ;;  %v3111_v15 = vpack.c.bf16 %v3105_v14, %v3100_v13  ;;  %v3121_v17 = vld [vmem:[%s3833_s1 + $0x58] sm:$0xff]  ;;  %v3132_v19 = vld [vmem:[%s3833_s1 + $0x60] sm:$0xff]  ;;  %v3137_v20 = vld [vmem:[%s3833_s1 + $0x68] sm:$0xff] }
   0x6   :  { %2479 = vmatprep.subr.bf16.mxu0 %v3056_v5  ;;  %v3127_v18 = vpack.c.bf16 %v3121_v17, %v3116_v16  ;;  %v3143_v21 = vpack.c.bf16 %v3137_v20, %v3132_v19  ;;  %v3148_v22 = vld [vmem:[%s3833_s1 + $0x70] sm:$0xff]  ;;  %v3153_v23 = vld [vmem:[%s3833_s1 + $0x78] sm:$0xff]  ;;  %v3166_v25 = vld [vmem:[%s3834_s0 + $0x8] sm:$0xff]  }
   0x7   :  { %v3159_v24 = vpack.c.bf16 %v3153_v23, %v3148_v22  ;;  %v3172_v26 = vld [vmem:[%s3834_s0 + $0x10] sm:$0xff]   ;;  %v3179_v27 = vld [vmem:[%s3834_s0 + $0x18] sm:$0xff]   ;;  %v3184_v28 = vld [vmem:[%s3834_s0 + $0x20] sm:$0xff]  }
   0x8   :  { %v3191_v29 = vld [vmem:[%s3834_s0 + $0x28] sm:$0xff]   ;;  %v3196_v30 = vld [vmem:[%s3834_s0 + $0x30] sm:$0xff]   ;;  %v3203_v31 = vld [vmem:[%s3834_s0 + $0x38] sm:$0xff]  }
   0x9   :  { %2480 = vmatpush3.bf16.msra.mxu0 %v3056_v5  ;;  %v2205_v32 = vld [vmem:[%s3835_s2 + $0x4] sm:$0xf]  ;;  %v58_v34 = vld [vmem:[%s3835_s2] sm:$0xf] }
   0xa   :  { %2481 = vmatprep.subr.bf16.mxu0 %v3078_v9  ;;  %2957 = vmatprep.subr.msk.bf16.mxu1 %vm255_vm0, %v2205_v32  ;;  %v257_v33 = vsel %vm255_vm0, %v2205_v32, 0  ;;  %v381_v45 = vsel %vm255_vm0, %v58_v34, 0 }
   0xb   :  { %2510 = vmatpush3.bf16.msra.mxu1 %v257_v33 }
   0xc   :  { %2958 = vmatprep.subr.msk.bf16.mxu1 %vm255_vm0, %v58_v34 }
   0xd   :  { %2482 = vmatpush3.bf16.msra.mxu0 %v3078_v9 }
   0xe   :  { %2483 = vmatprep.subr.bf16.mxu0 %v3095_v12 }
  0x11   :  { %2484 = vmatpush3.bf16.msra.mxu0 %v3095_v12 }
  0x12   :  { %2485 = vmatprep.subr.bf16.mxu0 %v3111_v15 }
  0x15   :  { %2486 = vmatpush3.bf16.msra.mxu0 %v3111_v15 }
  0x16   :  { %2487 = vmatprep.subr.bf16.mxu0 %v3127_v18 }
  0x19   :  { %2488 = vmatpush3.bf16.msra.mxu0 %v3127_v18 }
  0x1a   :  { %2489 = vmatprep.subr.bf16.mxu0 %v3143_v21 }
  0x1d   :  { %2490 = vmatpush3.bf16.msra.mxu0 %v3143_v21 }
  0x1e   :  { %2491 = vmatprep.subr.bf16.mxu0 %v3159_v24 }
  0x21   :  { %2492 = vmatpush3.bf16.msra.mxu0 %v3159_v24 }
  0x24   :  { %2494 = vmatmul.mubr.bf16.vlgmr.msra.gmra.mrb[0].mxu0 %v3166_v25 }
  0x25   :  { %2497 = vmatprep.mubr.bf16.mxu0 %v3172_v26 }
  0x2c   :  { %2498 = vmatmul.mubr.bf16.gmra.mrb[4].mxu0 %v3179_v27 }
  0x2d   :  { %2501 = vmatprep.mubr.bf16.mxu0 %v3184_v28 }
  0x34   :  { %2502 = vmatmul.mubr.bf16.gmra.mrb[8].mxu0 %v3191_v29 }
  0x35   :  { %2505 = vmatprep.mubr.bf16.mxu0 %v3196_v30 }
  0x3c   :  { %2506 = vmatmul.mubr.bf16.gmra.mrb[12].mxu0 %v3203_v31 }
  0x3d   :  { %2561 = vmatprep.mubr.bf16.mxu0 %v3088_v11 }
  0xf7   :  { %v2495_v35 = vpop.f32.mrb[0].mxu0 }
  0xf8   :  { %v141_v36 = vpop.f32.mrb[1].mxu0  ;;  %v3222_v42 = vmul.f32 0.5, %v2495_v35 }
  0xf9   :  { %v2496_v37 = vpop.f32.mrb[2].mxu0  ;;  %v3218_v40 = vmul.f32 0.5, %v141_v36 }
  0xfa   :  { %v3216_v38 = vmul.f32 0.5, %v2496_v37  ;;  %v144_v39 = vpop.f32.mrb[3].mxu0 }
  0xfb   :  { %v3220_v41 = vmul.f32 0.5, %v144_v39 }
  0xfc   :  { %v221_v44 = vpack.c.bf16 %v3216_v38, %v3222_v42 }
  0xfd   :  { %v220_v43 = vpack.c.bf16 %v3220_v41, %v3218_v40 }
  0xff   :  { %v2499_v46 = vpop.f32.mrb[4].mxu0  ;;  %2511 = vmatprep.mubr.msk.bf16.mxu1 %vm230_vm1, %v220_v43  ;;  %2545 = vmatprep.subr.bf16.mxu0 %v220_v43 }
 0x100   :  { %v157_v47 = vpop.f32.mrb[5].mxu0  ;;  %2512 = vmatmul.mubr.msk.bf16.vlgmr.msra.gmra.mrb[0].mxu1 %vm230_vm1, %v221_v44  ;;  %2546 = vmatpush3.bf16.msra.mxu0 %v220_v43  ;;  %v3237_v53 = vmul.f32 0.5, %v2499_v46 }
 0x101   :  { %v2500_v48 = vpop.f32.mrb[6].mxu0  ;;  %2547 = vmatprep.subr.bf16.mxu0 %v221_v44  ;;  %2528 = vmatpush3.bf16.msra.mxu1 %v381_v45  ;;  %v3233_v51 = vmul.f32 0.5, %v157_v47 }
 0x102   :  { %v3231_v49 = vmul.f32 0.5, %v2500_v48  ;;  %v160_v50 = vpop.f32.mrb[7].mxu0 }
 0x103   :  { %v3235_v52 = vmul.f32 0.5, %v160_v50 }
 0x104   :  { %2548 = vmatpush3.bf16.msra.mxu0 %v221_v44  ;;  %v223_v55 = vpack.c.bf16 %v3231_v49, %v3237_v53 }
 0x105   :  { %v222_v54 = vpack.c.bf16 %v3235_v52, %v3233_v51 }
 0x107   :  { %v2503_v56 = vpop.f32.mrb[8].mxu0  ;;  %2515 = vmatprep.mubr.msk.bf16.mxu1 %vm230_vm1, %v222_v54  ;;  %2549 = vmatprep.subr.bf16.mxu0 %v222_v54 }
 0x108   :  { %v173_v57 = vpop.f32.mrb[9].mxu0  ;;  %2516 = vmatmul.mubr.msk.bf16.gmra.mrb[4].mxu1 %vm230_vm1, %v223_v55  ;;  %2550 = vmatpush3.bf16.msra.mxu0 %v222_v54  ;;  %v3251_v63 = vmul.f32 0.5, %v2503_v56 }
 0x109   :  { %v2504_v58 = vpop.f32.mrb[10].mxu0  ;;  %2551 = vmatprep.subr.bf16.mxu0 %v223_v55  ;;  %v3247_v61 = vmul.f32 0.5, %v173_v57 }
 0x10a   :  { %v3245_v59 = vmul.f32 0.5, %v2504_v58  ;;  %v176_v60 = vpop.f32.mrb[11].mxu0 }
 0x10b   :  { %v3249_v62 = vmul.f32 0.5, %v176_v60 }
 0x10c   :  { %2552 = vmatpush3.bf16.msra.mxu0 %v223_v55  ;;  %v225_v33 = vpack.c.bf16 %v3245_v59, %v3251_v63 }
 0x10d   :  { %v224_v32 = vpack.c.bf16 %v3249_v62, %v3247_v61 }
 0x10f   :  { %v2507_v34 = vpop.f32.mrb[12].mxu0  ;;  %2519 = vmatprep.mubr.msk.bf16.mxu1 %vm230_vm1, %v224_v32  ;;  %2553 = vmatprep.subr.bf16.mxu0 %v224_v32 }
 0x110   :  { %v189_v35 = vpop.f32.mrb[13].mxu0  ;;  %2520 = vmatmul.mubr.msk.bf16.gmra.mrb[8].mxu1 %vm230_vm1, %v225_v33  ;;  %2554 = vmatpush3.bf16.msra.mxu0 %v224_v32  ;;  %v3265_v45 = vmul.f32 0.5, %v2507_v34 }
 0x111   :  { %v2508_v36 = vpop.f32.mrb[14].mxu0  ;;  %2555 = vmatprep.subr.bf16.mxu0 %v225_v33  ;;  %v3261_v43 = vmul.f32 0.5, %v189_v35 }
 0x112   :  { %v3259_v37 = vmul.f32 0.5, %v2508_v36  ;;  %v192_v39 = vpop.f32.mrb[15].mxu0 }
 0x113   :  { %v3263_v44 = vmul.f32 0.5, %v192_v39 }
 0x114   :  { %2556 = vmatpush3.bf16.msra.mxu0 %v225_v33  ;;  %v227_v47 = vpack.c.bf16 %v3259_v37, %v3265_v45 }
 0x115   :  { %v226_v46 = vpack.c.bf16 %v3263_v44, %v3261_v43 }
 0x117   :  { %2523 = vmatprep.mubr.msk.bf16.mxu1 %vm230_vm1, %v226_v46  ;;  %2557 = vmatprep.subr.bf16.mxu0 %v226_v46 }
 0x118   :  { %2524 = vmatmul.mubr.msk.bf16.gmra.mrb[12].mxu1 %vm230_vm1, %v227_v47  ;;  %2558 = vmatpush3.bf16.msra.mxu0 %v226_v46 }
 0x119   :  { %2559 = vmatprep.subr.bf16.mxu0 %v227_v47  ;;  %2529 = vmatprep.mubr.msk.bf16.mxu1 %vm230_vm1, %v3047_v3  ;;  %v2222_v3 = vld [vmem:[%s3835_s2 + $0x8] sm:$0xf] }
 0x11a   :  { %2959 = vmatprep.subr.msk.bf16.mxu1 %vm255_vm0, %v2222_v3 }
 0x11c   :  { %2560 = vmatpush3.bf16.msra.mxu0 %v227_v47 }
 0x11f   :  { %2562 = vmatmul.mubr.bf16.vlgmr.msra.gmra.mrb[16].mxu0 %v3166_v25 }
 0x120   :  { %2565 = vmatprep.mubr.bf16.mxu0 %v3172_v26  ;;  %2530 = vmatmul.mubr.msk.bf16.vlgmr.msra.gmra.mrb[0].mxu1 %vm230_vm1, %v3056_v5  ;;  %v628_v5 = vsel %vm255_vm0, %v2222_v3, 0 }
 0x121   :  { %2533 = vmatprep.mubr.msk.bf16.mxu1 %vm230_vm1, %v3078_v9  ;;  %2578 = vmatpush3.bf16.msra.mxu1 %v628_v5 }
 0x127   :  { %2566 = vmatmul.mubr.bf16.gmra.mrb[20].mxu0 %v3179_v27 }
 0x128   :  { %2569 = vmatprep.mubr.bf16.mxu0 %v3184_v28  ;;  %2534 = vmatmul.mubr.msk.bf16.gmra.mrb[4].mxu1 %vm230_vm1, %v3095_v12 }
 0x129   :  { %2537 = vmatprep.mubr.msk.bf16.mxu1 %vm230_vm1, %v3111_v15 }
 0x12f   :  { %2570 = vmatmul.mubr.bf16.gmra.mrb[24].mxu0 %v3191_v29 }
 0x130   :  { %2573 = vmatprep.mubr.bf16.mxu0 %v3196_v30  ;;  %2538 = vmatmul.mubr.msk.bf16.gmra.mrb[8].mxu1 %vm230_vm1, %v3127_v18 }
 0x131   :  { %2541 = vmatprep.mubr.msk.bf16.mxu1 %vm230_vm1, %v3143_v21 }
 0x137   :  { %2574 = vmatmul.mubr.bf16.gmra.mrb[28].mxu0 %v3203_v31 }
 0x138   :  { %2542 = vmatmul.mubr.msk.bf16.gmra.mrb[12].mxu1 %vm230_vm1, %v3159_v24  ;;  %2611 = vmatprep.mubr.bf16.mxu0 %v3088_v11 }
 0x1f2   :  { %v2563_v9 = vpop.f32.mrb[16].mxu0 }
 0x1f3   :  { %v514_v12 = vpop.f32.mrb[17].mxu0  ;;  %v3312_v50 = vsub.f32 %v2563_v9, %v3043_v2 }
 0x1f4   :  { %v2564_v15 = vpop.f32.mrb[18].mxu0  ;;  %v3306_v24 = vsub.f32 %v514_v12, %v3033_v0 }
 0x1f5   :  { %v3303_v18 = vsub.f32 %v2564_v15, %v3052_v4  ;;  %v517_v21 = vpop.f32.mrb[19].mxu0 }
 0x1f6   :  { %v3309_v48 = vsub.f32 %v517_v21, %v3038_v1 }
 0x1f7   :  { %v594_v55 = vpack.c.bf16 %v3303_v18, %v3312_v50 }
 0x1f8   :  { %v593_v54 = vpack.c.bf16 %v3309_v48, %v3306_v24 }
 0x1fa   :  { %v2567_v56 = vpop.f32.mrb[20].mxu0  ;;  %2579 = vmatprep.mubr.msk.bf16.mxu1 %vm230_vm1, %v593_v54  ;;  %2595 = vmatprep.subr.bf16.mxu0 %v593_v54 }
 0x1fb   :  { %v530_v4 = vpop.f32.mrb[21].mxu0  ;;  %2580 = vmatmul.mubr.msk.bf16.vlgmr.msra.gmra.mrb[0].mxu1 %vm230_vm1, %v594_v55  ;;  %2596 = vmatpush3.bf16.msra.mxu0 %v593_v54  ;;  %v3330_v60 = vsub.f32 %v2567_v56, %v3073_v8 }
 0x1fc   :  { %v2568_v0 = vpop.f32.mrb[22].mxu0  ;;  %2597 = vmatprep.subr.bf16.mxu0 %v594_v55  ;;  %v3324_v57 = vsub.f32 %v530_v4, %v3061_v6 }
 0x1fd   :  { %v3321_v1 = vsub.f32 %v2568_v0, %v3083_v10  ;;  %v533_v2 = vpop.f32.mrb[23].mxu0 }
 0x1fe   :  { %v3327_v58 = vsub.f32 %v533_v2, %v3066_v7 }
 0x1ff   :  { %2598 = vmatpush3.bf16.msra.mxu0 %v594_v55  ;;  %v596_v33 = vpack.c.bf16 %v3321_v1, %v3330_v60 }
 0x200   :  { %v595_v32 = vpack.c.bf16 %v3327_v58, %v3324_v57 }
 0x202   :  { %v2571_v34 = vpop.f32.mrb[24].mxu0  ;;  %2583 = vmatprep.mubr.msk.bf16.mxu1 %vm230_vm1, %v595_v32  ;;  %2599 = vmatprep.subr.bf16.mxu0 %v595_v32 }
 0x203   :  { %v546_v10 = vpop.f32.mrb[25].mxu0  ;;  %2584 = vmatmul.mubr.msk.bf16.gmra.mrb[4].mxu1 %vm230_vm1, %v596_v33  ;;  %2600 = vmatpush3.bf16.msra.mxu0 %v595_v32  ;;  %v3348_v39 = vsub.f32 %v2571_v34, %v3116_v16 }
 0x204   :  { %v2572_v6 = vpop.f32.mrb[26].mxu0  ;;  %2601 = vmatprep.subr.bf16.mxu0 %v596_v33  ;;  %v3342_v35 = vsub.f32 %v546_v10, %v3100_v13 }
 0x205   :  { %v3339_v7 = vsub.f32 %v2572_v6, %v3121_v17  ;;  %v549_v8 = vpop.f32.mrb[27].mxu0 }
 0x206   :  { %v3345_v36 = vsub.f32 %v549_v8, %v3105_v14 }
 0x207   :  { %2602 = vmatpush3.bf16.msra.mxu0 %v596_v33  ;;  %v598_v47 = vpack.c.bf16 %v3339_v7, %v3348_v39 }
 0x208   :  { %v597_v46 = vpack.c.bf16 %v3345_v36, %v3342_v35 }
 0x20a   :  { %v2575_v3 = vpop.f32.mrb[28].mxu0  ;;  %2587 = vmatprep.mubr.msk.bf16.mxu1 %vm230_vm1, %v597_v46  ;;  %2603 = vmatprep.subr.bf16.mxu0 %v597_v46 }
 0x20b   :  { %v562_v17 = vpop.f32.mrb[29].mxu0  ;;  %2588 = vmatmul.mubr.msk.bf16.gmra.mrb[8].mxu1 %vm230_vm1, %v598_v47  ;;  %2604 = vmatpush3.bf16.msra.mxu0 %v597_v46  ;;  %v3366_v12 = vsub.f32 %v2575_v3, %v3148_v22 }
 0x20c   :  { %v2576_v13 = vpop.f32.mrb[30].mxu0  ;;  %2605 = vmatprep.subr.bf16.mxu0 %v598_v47  ;;  %v3360_v5 = vsub.f32 %v562_v17, %v3132_v19  ;;  %v2231_v19 = vld [vmem:[%s3835_s2 + $0xc] sm:$0xf] }
 0x20d   :  { %v3357_v14 = vsub.f32 %v2576_v13, %v3153_v23  ;;  %v565_v16 = vpop.f32.mrb[31].mxu0  ;;  %2960 = vmatprep.subr.msk.bf16.mxu1 %vm255_vm0, %v2231_v19 }
 0x20e   :  { %v3363_v9 = vsub.f32 %v565_v16, %v3137_v20  ;;  %v891_v20 = vsel %vm255_vm0, %v2231_v19, 0 }
 0x20f   :  { %2606 = vmatpush3.bf16.msra.mxu0 %v598_v47  ;;  %v600_v21 = vpack.c.bf16 %v3357_v14, %v3366_v12  ;;  %2628 = vmatpush3.bf16.msra.mxu1 %v891_v20 }
 0x210   :  { %v599_v15 = vpack.c.bf16 %v3363_v9, %v3360_v5 }
 0x212   :  { %2591 = vmatprep.mubr.msk.bf16.mxu1 %vm230_vm1, %v599_v15  ;;  %2607 = vmatprep.subr.bf16.mxu0 %v599_v15 }
 0x213   :  { %2592 = vmatmul.mubr.msk.bf16.gmra.mrb[12].mxu1 %vm230_vm1, %v600_v21  ;;  %2608 = vmatpush3.bf16.msra.mxu0 %v599_v15 }
 0x214   :  { %2609 = vmatprep.subr.bf16.mxu0 %v600_v21 }
 0x217   :  { %2610 = vmatpush3.bf16.msra.mxu0 %v600_v21 }
 0x21a   :  { %2612 = vmatmul.mubr.bf16.vlgmr.msra.gmra.mrb[32].mxu0 %v3166_v25 }
 0x21b   :  { %2615 = vmatprep.mubr.bf16.mxu0 %v3172_v26 }
 0x222   :  { %2616 = vmatmul.mubr.bf16.gmra.mrb[36].mxu0 %v3179_v27 }
 0x223   :  { %2619 = vmatprep.mubr.bf16.mxu0 %v3184_v28 }
 0x22a   :  { %2620 = vmatmul.mubr.bf16.gmra.mrb[40].mxu0 %v3191_v29 }
 0x22b   :  { %2623 = vmatprep.mubr.bf16.mxu0 %v3196_v30 }
 0x232   :  { %2624 = vmatmul.mubr.bf16.gmra.mrb[44].mxu0 %v3203_v31 }
 0x233   :  { %2661 = vmatprep.mubr.bf16.mxu0 %v3088_v11 }
 0x2ed   :  { %v2613_v22 = vpop.f32.mrb[32].mxu0 }
 0x2ee   :  { %v777_v23 = vpop.f32.mrb[33].mxu0  ;;  %v3397_v2 = vsub.f32 %v2613_v22, %v3222_v42 }
 0x2ef   :  { %v2614_v54 = vpop.f32.mrb[34].mxu0  ;;  %v3391_v4 = vsub.f32 %v777_v23, %v3218_v40 }
 0x2f0   :  { %v3388_v55 = vsub.f32 %v2614_v54, %v3216_v38  ;;  %v780_v56 = vpop.f32.mrb[35].mxu0 }
 0x2f1   :  { %v3394_v0 = vsub.f32 %v780_v56, %v3220_v41 }
 0x2f2   :  { %v857_v33 = vpack.c.bf16 %v3388_v55, %v3397_v2 }
 0x2f3   :  { %v856_v32 = vpack.c.bf16 %v3394_v0, %v3391_v4 }
 0x2f5   :  { %v2617_v34 = vpop.f32.mrb[36].mxu0  ;;  %2629 = vmatprep.mubr.msk.bf16.mxu1 %vm230_vm1, %v856_v32  ;;  %2645 = vmatprep.subr.bf16.mxu0 %v856_v32 }
 0x2f6   :  { %v793_v38 = vpop.f32.mrb[37].mxu0  ;;  %2630 = vmatmul.mubr.msk.bf16.vlgmr.msra.gmra.mrb[0].mxu1 %vm230_vm1, %v857_v33  ;;  %2646 = vmatpush3.bf16.msra.mxu0 %v856_v32  ;;  %v3415_v8 = vsub.f32 %v2617_v34, %v3237_v53 }
 0x2f7   :  { %v2618_v40 = vpop.f32.mrb[38].mxu0  ;;  %2647 = vmatprep.subr.bf16.mxu0 %v857_v33  ;;  %v3409_v10 = vsub.f32 %v793_v38, %v3233_v51 }
 0x2f8   :  { %v3406_v41 = vsub.f32 %v2618_v40, %v3231_v49  ;;  %v796_v42 = vpop.f32.mrb[39].mxu0 }
 0x2f9   :  { %v3412_v6 = vsub.f32 %v796_v42, %v3235_v52 }
 0x2fa   :  { %2648 = vmatpush3.bf16.msra.mxu0 %v857_v33  ;;  %v859_v47 = vpack.c.bf16 %v3406_v41, %v3415_v8 }
 0x2fb   :  { %v858_v46 = vpack.c.bf16 %v3412_v6, %v3409_v10 }
 0x2fd   :  { %v2621_v3 = vpop.f32.mrb[40].mxu0  ;;  %2633 = vmatprep.mubr.msk.bf16.mxu1 %vm230_vm1, %v858_v46  ;;  %2649 = vmatprep.subr.bf16.mxu0 %v858_v46 }
 0x2fe   :  { %v809_v49 = vpop.f32.mrb[41].mxu0  ;;  %2634 = vmatmul.mubr.msk.bf16.gmra.mrb[4].mxu1 %vm230_vm1, %v859_v47  ;;  %2650 = vmatpush3.bf16.msra.mxu0 %v858_v46  ;;  %v3433_v16 = vsub.f32 %v2621_v3, %v3251_v63 }
 0x2ff   :  { %v2622_v51 = vpop.f32.mrb[42].mxu0  ;;  %2651 = vmatprep.subr.bf16.mxu0 %v859_v47  ;;  %v3427_v17 = vsub.f32 %v809_v49, %v3247_v61 }
 0x300   :  { %v3424_v52 = vsub.f32 %v2622_v51, %v3245_v59  ;;  %v812_v53 = vpop.f32.mrb[43].mxu0 }
 0x301   :  { %v3430_v13 = vsub.f32 %v812_v53, %v3249_v62 }
 0x302   :  { %2652 = vmatpush3.bf16.msra.mxu0 %v859_v47  ;;  %v861_v21 = vpack.c.bf16 %v3424_v52, %v3433_v16 }
 0x303   :  { %v860_v15 = vpack.c.bf16 %v3430_v13, %v3427_v17 }
 0x305   :  { %v2625_v19 = vpop.f32.mrb[44].mxu0  ;;  %2637 = vmatprep.mubr.msk.bf16.mxu1 %vm230_vm1, %v860_v15  ;;  %2653 = vmatprep.subr.bf16.mxu0 %v860_v15 }
 0x306   :  { %v825_v59 = vpop.f32.mrb[45].mxu0  ;;  %2638 = vmatmul.mubr.msk.bf16.gmra.mrb[8].mxu1 %vm230_vm1, %v861_v21  ;;  %2654 = vmatpush3.bf16.msra.mxu0 %v860_v15  ;;  %v3451_v23 = vsub.f32 %v2625_v19, %v3265_v45 }
 0x307   :  { %v2626_v61 = vpop.f32.mrb[46].mxu0  ;;  %2655 = vmatprep.subr.bf16.mxu0 %v861_v21  ;;  %v3445_v20 = vsub.f32 %v825_v59, %v3261_v43 }
 0x308   :  { %v3442_v62 = vsub.f32 %v2626_v61, %v3259_v37  ;;  %v828_v63 = vpop.f32.mrb[47].mxu0  ;;  %v2240_v37 = vld [vmem:[%s3835_s2 + $0x10] sm:$0xf] }
 0x309   :  { %v3448_v22 = vsub.f32 %v828_v63, %v3263_v44  ;;  %2961 = vmatprep.subr.msk.bf16.mxu1 %vm255_vm0, %v2240_v37  ;;  %v1154_v43 = vsel %vm255_vm0, %v2240_v37, 0 }
 0x30a   :  { %2656 = vmatpush3.bf16.msra.mxu0 %v861_v21  ;;  %v863_v56 = vpack.c.bf16 %v3442_v62, %v3451_v23  ;;  %2678 = vmatpush3.bf16.msra.mxu1 %v1154_v43 }
 0x30b   :  { %v862_v54 = vpack.c.bf16 %v3448_v22, %v3445_v20 }
 0x30d   :  { %2641 = vmatprep.mubr.msk.bf16.mxu1 %vm230_vm1, %v862_v54  ;;  %2657 = vmatprep.subr.bf16.mxu0 %v862_v54 }
 0x30e   :  { %2642 = vmatmul.mubr.msk.bf16.gmra.mrb[12].mxu1 %vm230_vm1, %v863_v56  ;;  %2658 = vmatpush3.bf16.msra.mxu0 %v862_v54 }
 0x30f   :  { %2659 = vmatprep.subr.bf16.mxu0 %v863_v56 }
 0x312   :  { %2660 = vmatpush3.bf16.msra.mxu0 %v863_v56 }
 0x315   :  { %2662 = vmatmul.mubr.bf16.vlgmr.msra.gmra.mrb[48].mxu0 %v3166_v25 }
 0x316   :  { %2665 = vmatprep.mubr.bf16.mxu0 %v3172_v26 }
 0x31d   :  { %2666 = vmatmul.mubr.bf16.gmra.mrb[52].mxu0 %v3179_v27 }
 0x31e   :  { %2669 = vmatprep.mubr.bf16.mxu0 %v3184_v28 }
 0x325   :  { %2670 = vmatmul.mubr.bf16.gmra.mrb[56].mxu0 %v3191_v29 }
 0x326   :  { %2673 = vmatprep.mubr.bf16.mxu0 %v3196_v30 }
 0x32d   :  { %2674 = vmatmul.mubr.bf16.gmra.mrb[60].mxu0 %v3203_v31 }
 0x32e   :  { %2711 = vmatprep.mubr.bf16.mxu0 %v3088_v11 }
 0x3e8   :  { %v2663_v44 = vpop.f32.mrb[48].mxu0 }
 0x3e9   :  { %v1040_v45 = vpop.f32.mrb[49].mxu0  ;;  %v3482_v42 = vsub.f32 %v2663_v44, %v3312_v50 }
 0x3ea   :  { %v2664_v32 = vpop.f32.mrb[50].mxu0  ;;  %v3476_v38 = vsub.f32 %v1040_v45, %v3306_v24 }
 0x3eb   :  { %v3473_v33 = vsub.f32 %v2664_v32, %v3303_v18  ;;  %v1043_v34 = vpop.f32.mrb[51].mxu0 }
 0x3ec   :  { %v3479_v40 = vsub.f32 %v1043_v34, %v3309_v48 }
 0x3ed   :  { %v1120_v47 = vpack.c.bf16 %v3473_v33, %v3482_v42 }
 0x3ee   :  { %v1119_v46 = vpack.c.bf16 %v3479_v40, %v3476_v38 }
 0x3f0   :  { %v2667_v3 = vpop.f32.mrb[52].mxu0  ;;  %2679 = vmatprep.mubr.msk.bf16.mxu1 %vm230_vm1, %v1119_v46  ;;  %2695 = vmatprep.subr.bf16.mxu0 %v1119_v46 }
 0x3f1   :  { %v1056_v18 = vpop.f32.mrb[53].mxu0  ;;  %2680 = vmatmul.mubr.msk.bf16.vlgmr.msra.gmra.mrb[0].mxu1 %vm230_vm1, %v1120_v47  ;;  %2696 = vmatpush3.bf16.msra.mxu0 %v1119_v46  ;;  %v3500_v53 = vsub.f32 %v2667_v3, %v3330_v60 }
 0x3f2   :  { %v2668_v24 = vpop.f32.mrb[54].mxu0  ;;  %2697 = vmatprep.subr.bf16.mxu0 %v1120_v47  ;;  %v3494_v49 = vsub.f32 %v1056_v18, %v3324_v57 }
 0x3f3   :  { %v3491_v48 = vsub.f32 %v2668_v24, %v3321_v1  ;;  %v1059_v50 = vpop.f32.mrb[55].mxu0 }
 0x3f4   :  { %v3497_v51 = vsub.f32 %v1059_v50, %v3327_v58 }
 0x3f5   :  { %2698 = vmatpush3.bf16.msra.mxu0 %v1120_v47  ;;  %v1122_v21 = vpack.c.bf16 %v3491_v48, %v3500_v53 }
 0x3f6   :  { %v1121_v15 = vpack.c.bf16 %v3497_v51, %v3494_v49 }
 0x3f8   :  { %v2671_v19 = vpop.f32.mrb[56].mxu0  ;;  %2683 = vmatprep.mubr.msk.bf16.mxu1 %vm230_vm1, %v1121_v15  ;;  %2699 = vmatprep.subr.bf16.mxu0 %v1121_v15 }
 0x3f9   :  { %v1072_v1 = vpop.f32.mrb[57].mxu0  ;;  %2684 = vmatmul.mubr.msk.bf16.gmra.mrb[4].mxu1 %vm230_vm1, %v1122_v21  ;;  %2700 = vmatpush3.bf16.msra.mxu0 %v1121_v15  ;;  %v3518_v63 = vsub.f32 %v2671_v19, %v3348_v39 }
 0x3fa   :  { %v2672_v57 = vpop.f32.mrb[58].mxu0  ;;  %2701 = vmatprep.subr.bf16.mxu0 %v1122_v21  ;;  %v3512_v59 = vsub.f32 %v1072_v1, %v3342_v35 }
 0x3fb   :  { %v3509_v58 = vsub.f32 %v2672_v57, %v3339_v7  ;;  %v1075_v60 = vpop.f32.mrb[59].mxu0 }
 0x3fc   :  { %v3515_v61 = vsub.f32 %v1075_v60, %v3345_v36 }
 0x3fd   :  { %2702 = vmatpush3.bf16.msra.mxu0 %v1122_v21  ;;  %v1124_v56 = vpack.c.bf16 %v3509_v58, %v3518_v63 }
 0x3fe   :  { %v1123_v54 = vpack.c.bf16 %v3515_v61, %v3512_v59 }
 0x400   :  { %v2675_v37 = vpop.f32.mrb[60].mxu0  ;;  %2687 = vmatprep.mubr.msk.bf16.mxu1 %vm230_vm1, %v1123_v54  ;;  %2703 = vmatprep.subr.bf16.mxu0 %v1123_v54 }
 0x401   :  { %v1088_v7 = vpop.f32.mrb[61].mxu0  ;;  %2688 = vmatmul.mubr.msk.bf16.gmra.mrb[8].mxu1 %vm230_vm1, %v1124_v56  ;;  %2704 = vmatpush3.bf16.msra.mxu0 %v1123_v54  ;;  %v3536_v45 = vsub.f32 %v2675_v37, %v3366_v12 }
 0x402   :  { %v2676_v35 = vpop.f32.mrb[62].mxu0  ;;  %2705 = vmatprep.subr.bf16.mxu0 %v1124_v56  ;;  %v3530_v43 = vsub.f32 %v1088_v7, %v3360_v5 }
 0x403   :  { %v3527_v36 = vsub.f32 %v2676_v35, %v3357_v14  ;;  %v1091_v39 = vpop.f32.mrb[63].mxu0  ;;  %v2249_v14 = vld [vmem:[%s3835_s2 + $0x14] sm:$0xf] }
 0x404   :  { %v3533_v44 = vsub.f32 %v1091_v39, %v3363_v9  ;;  %2962 = vmatprep.subr.msk.bf16.mxu1 %vm255_vm0, %v2249_v14  ;;  %v1417_v5 = vsel %vm255_vm0, %v2249_v14, 0 }
 0x405   :  { %2706 = vmatpush3.bf16.msra.mxu0 %v1124_v56  ;;  %v1126_v34 = vpack.c.bf16 %v3527_v36, %v3536_v45  ;;  %2728 = vmatpush3.bf16.msra.mxu1 %v1417_v5 }
 0x406   :  { %v1125_v32 = vpack.c.bf16 %v3533_v44, %v3530_v43 }
 0x408   :  { %2691 = vmatprep.mubr.msk.bf16.mxu1 %vm230_vm1, %v1125_v32  ;;  %2707 = vmatprep.subr.bf16.mxu0 %v1125_v32 }
 0x409   :  { %2692 = vmatmul.mubr.msk.bf16.gmra.mrb[12].mxu1 %vm230_vm1, %v1126_v34  ;;  %2708 = vmatpush3.bf16.msra.mxu0 %v1125_v32 }
 0x40a   :  { %2709 = vmatprep.subr.bf16.mxu0 %v1126_v34 }
 0x40d   :  { %2710 = vmatpush3.bf16.msra.mxu0 %v1126_v34 }
 0x410   :  { %2712 = vmatmul.mubr.bf16.vlgmr.msra.gmra.mrb[64].mxu0 %v3166_v25 }
 0x411   :  { %2715 = vmatprep.mubr.bf16.mxu0 %v3172_v26 }
 0x418   :  { %2716 = vmatmul.mubr.bf16.gmra.mrb[68].mxu0 %v3179_v27 }
 0x419   :  { %2719 = vmatprep.mubr.bf16.mxu0 %v3184_v28 }
 0x420   :  { %2720 = vmatmul.mubr.bf16.gmra.mrb[72].mxu0 %v3191_v29 }
 0x421   :  { %2723 = vmatprep.mubr.bf16.mxu0 %v3196_v30 }
 0x428   :  { %2724 = vmatmul.mubr.bf16.gmra.mrb[76].mxu0 %v3203_v31 }
 0x429   :  { %2761 = vmatprep.mubr.bf16.mxu0 %v3088_v11 }
 0x4e3   :  { %v2713_v9 = vpop.f32.mrb[64].mxu0 }
 0x4e4   :  { %v1303_v12 = vpop.f32.mrb[65].mxu0  ;;  %v3567_v50 = vsub.f32 %v2713_v9, %v3397_v2 }
 0x4e5   :  { %v2714_v46 = vpop.f32.mrb[66].mxu0  ;;  %v3561_v18 = vsub.f32 %v1303_v12, %v3391_v4 }
 0x4e6   :  { %v3558_v47 = vsub.f32 %v2714_v46, %v3388_v55  ;;  %v1306_v3 = vpop.f32.mrb[67].mxu0 }
 0x4e7   :  { %v3564_v24 = vsub.f32 %v1306_v3, %v3394_v0 }
 0x4e8   :  { %v1383_v21 = vpack.c.bf16 %v3558_v47, %v3567_v50 }
 0x4e9   :  { %v1382_v15 = vpack.c.bf16 %v3564_v24, %v3561_v18 }
 0x4eb   :  { %v2717_v19 = vpop.f32.mrb[68].mxu0  ;;  %2729 = vmatprep.mubr.msk.bf16.mxu1 %vm230_vm1, %v1382_v15  ;;  %2745 = vmatprep.subr.bf16.mxu0 %v1382_v15 }
 0x4ec   :  { %v1319_v55 = vpop.f32.mrb[69].mxu0  ;;  %2730 = vmatmul.mubr.msk.bf16.vlgmr.msra.gmra.mrb[0].mxu1 %vm230_vm1, %v1383_v21  ;;  %2746 = vmatpush3.bf16.msra.mxu0 %v1382_v15  ;;  %v3585_v60 = vsub.f32 %v2717_v19, %v3415_v8 }
 0x4ed   :  { %v2718_v4 = vpop.f32.mrb[70].mxu0  ;;  %2747 = vmatprep.subr.bf16.mxu0 %v1383_v21  ;;  %v3579_v1 = vsub.f32 %v1319_v55, %v3409_v10 }
 0x4ee   :  { %v3576_v0 = vsub.f32 %v2718_v4, %v3406_v41  ;;  %v1322_v2 = vpop.f32.mrb[71].mxu0 }
 0x4ef   :  { %v3582_v57 = vsub.f32 %v1322_v2, %v3412_v6 }
 0x4f0   :  { %2748 = vmatpush3.bf16.msra.mxu0 %v1383_v21  ;;  %v1385_v56 = vpack.c.bf16 %v3576_v0, %v3585_v60 }
 0x4f1   :  { %v1384_v54 = vpack.c.bf16 %v3582_v57, %v3579_v1 }
 0x4f3   :  { %v2721_v37 = vpop.f32.mrb[72].mxu0  ;;  %2733 = vmatprep.mubr.msk.bf16.mxu1 %vm230_vm1, %v1384_v54  ;;  %2749 = vmatprep.subr.bf16.mxu0 %v1384_v54 }
 0x4f4   :  { %v1335_v41 = vpop.f32.mrb[73].mxu0  ;;  %2734 = vmatmul.mubr.msk.bf16.gmra.mrb[4].mxu1 %vm230_vm1, %v1385_v56  ;;  %2750 = vmatpush3.bf16.msra.mxu0 %v1384_v54  ;;  %v3603_v39 = vsub.f32 %v2721_v37, %v3433_v16 }
 0x4f5   :  { %v2722_v10 = vpop.f32.mrb[74].mxu0  ;;  %2751 = vmatprep.subr.bf16.mxu0 %v1385_v56  ;;  %v3597_v7 = vsub.f32 %v1335_v41, %v3427_v17 }
 0x4f6   :  { %v3594_v6 = vsub.f32 %v2722_v10, %v3424_v52  ;;  %v1338_v8 = vpop.f32.mrb[75].mxu0 }
 0x4f7   :  { %v3600_v35 = vsub.f32 %v1338_v8, %v3430_v13 }
 0x4f8   :  { %2752 = vmatpush3.bf16.msra.mxu0 %v1385_v56  ;;  %v1387_v34 = vpack.c.bf16 %v3594_v6, %v3603_v39 }
 0x4f9   :  { %v1386_v32 = vpack.c.bf16 %v3600_v35, %v3597_v7 }
 0x4fb   :  { %v2725_v14 = vpop.f32.mrb[76].mxu0  ;;  %2737 = vmatprep.mubr.msk.bf16.mxu1 %vm230_vm1, %v1386_v32  ;;  %2753 = vmatprep.subr.bf16.mxu0 %v1386_v32 }
 0x4fc   :  { %v1351_v52 = vpop.f32.mrb[77].mxu0  ;;  %2738 = vmatmul.mubr.msk.bf16.gmra.mrb[8].mxu1 %vm230_vm1, %v1387_v34  ;;  %2754 = vmatpush3.bf16.msra.mxu0 %v1386_v32  ;;  %v3621_v12 = vsub.f32 %v2725_v14, %v3451_v23 }
 0x4fd   :  { %v2726_v17 = vpop.f32.mrb[78].mxu0  ;;  %2755 = vmatprep.subr.bf16.mxu0 %v1387_v34  ;;  %v3615_v5 = vsub.f32 %v1351_v52, %v3445_v20 }
 0x4fe   :  { %v3612_v13 = vsub.f32 %v2726_v17, %v3442_v62  ;;  %v1354_v16 = vpop.f32.mrb[79].mxu0  ;;  %v2258_v62 = vld [vmem:[%s3835_s2 + $0x18] sm:$0xf] }
 0x4ff   :  { %v3618_v9 = vsub.f32 %v1354_v16, %v3448_v22  ;;  %2963 = vmatprep.subr.msk.bf16.mxu1 %vm255_vm0, %v2258_v62  ;;  %v1680_v20 = vsel %vm255_vm0, %v2258_v62, 0  ;;  %v2267_v22 = vld [vmem:[%s3835_s2 + $0x1c] sm:$0xf] }
 0x500   :  { %2756 = vmatpush3.bf16.msra.mxu0 %v1387_v34  ;;  %v1389_v3 = vpack.c.bf16 %v3612_v13, %v3621_v12  ;;  %2778 = vmatpush3.bf16.msra.mxu1 %v1680_v20  ;;  %v1943_v37 = vsel %vm255_vm0, %v2267_v22, 0 }
 0x501   :  { %v1388_v46 = vpack.c.bf16 %v3618_v9, %v3615_v5  ;;  %2964 = vmatprep.subr.msk.bf16.mxu1 %vm255_vm0, %v2267_v22 }
 0x503   :  { %2741 = vmatprep.mubr.msk.bf16.mxu1 %vm230_vm1, %v1388_v46  ;;  %2757 = vmatprep.subr.bf16.mxu0 %v1388_v46 }
 0x504   :  { %2742 = vmatmul.mubr.msk.bf16.gmra.mrb[12].mxu1 %vm230_vm1, %v1389_v3  ;;  %2758 = vmatpush3.bf16.msra.mxu0 %v1388_v46 }
 0x505   :  { %2759 = vmatprep.subr.bf16.mxu0 %v1389_v3 }
 0x508   :  { %2760 = vmatpush3.bf16.msra.mxu0 %v1389_v3 }
 0x50b   :  { %2762 = vmatmul.mubr.bf16.vlgmr.msra.gmra.mrb[80].mxu0 %v3166_v25 }
 0x50c   :  { %2765 = vmatprep.mubr.bf16.mxu0 %v3172_v26 }
 0x513   :  { %2766 = vmatmul.mubr.bf16.gmra.mrb[84].mxu0 %v3179_v27 }
 0x514   :  { %2769 = vmatprep.mubr.bf16.mxu0 %v3184_v28 }
 0x51b   :  { %2770 = vmatmul.mubr.bf16.gmra.mrb[88].mxu0 %v3191_v29 }
 0x51c   :  { %2773 = vmatprep.mubr.bf16.mxu0 %v3196_v30 }
 0x523   :  { %2774 = vmatmul.mubr.bf16.gmra.mrb[92].mxu0 %v3203_v31 }
 0x524   :  { %2811 = vmatprep.mubr.bf16.mxu0 %v3088_v11 }
 0x5de   :  { %v2763_v23 = vpop.f32.mrb[80].mxu0 }
 0x5df   :  { %v1566_v15 = vpop.f32.mrb[81].mxu0  ;;  %v1631_v11 = vsub.f32 %v2763_v23, %v3482_v42 }
 0x5e0   :  { %v2764_v21 = vpop.f32.mrb[82].mxu0  ;;  %v1629_v4 = vsub.f32 %v1566_v15, %v3476_v38 }
 0x5e1   :  { %v1632_v19 = vsub.f32 %v2764_v21, %v3473_v33  ;;  %v1569_v55 = vpop.f32.mrb[83].mxu0 }
 0x5e2   :  { %v1630_v2 = vsub.f32 %v1569_v55, %v3479_v40 }
 0x5e3   :  { %v1646_v54 = vpack.c.bf16 %v1632_v19, %v1631_v11 }
 0x5e4   :  { %v1645_v56 = vpack.c.bf16 %v1630_v2, %v1629_v4 }
 0x5e6   :  { %v2767_v41 = vpop.f32.mrb[84].mxu0  ;;  %2779 = vmatprep.mubr.msk.bf16.mxu1 %vm230_vm1, %v1645_v56  ;;  %2795 = vmatprep.subr.bf16.mxu0 %v1645_v56 }
 0x5e7   :  { %v1582_v10 = vpop.f32.mrb[85].mxu0  ;;  %2780 = vmatmul.mubr.msk.bf16.vlgmr.msra.gmra.mrb[0].mxu1 %vm230_vm1, %v1646_v54  ;;  %2796 = vmatpush3.bf16.msra.mxu0 %v1645_v56  ;;  %v1635_v33 = vsub.f32 %v2767_v41, %v3500_v53 }
 0x5e8   :  { %v2768_v42 = vpop.f32.mrb[86].mxu0  ;;  %2797 = vmatprep.subr.bf16.mxu0 %v1646_v54  ;;  %2828 = vmatpush3.bf16.msra.mxu1 %v1943_v37  ;;  %v1633_v8 = vsub.f32 %v1582_v10, %v3494_v49 }
 0x5e9   :  { %v1636_v38 = vsub.f32 %v2768_v42, %v3491_v48  ;;  %v1585_v40 = vpop.f32.mrb[87].mxu0 }
 0x5ea   :  { %v1634_v32 = vsub.f32 %v1585_v40, %v3497_v51 }
 0x5eb   :  { %v1648_v34 = vpack.c.bf16 %v1636_v38, %v1635_v33  ;;  %2798 = vmatpush3.bf16.msra.mxu0 %v1646_v54 }
 0x5ec   :  { %v1647_v14 = vpack.c.bf16 %v1634_v32, %v1633_v8 }
 0x5ee   :  { %v2771_v52 = vpop.f32.mrb[88].mxu0  ;;  %2783 = vmatprep.mubr.msk.bf16.mxu1 %vm230_vm1, %v1647_v14  ;;  %2799 = vmatprep.subr.bf16.mxu0 %v1647_v14 }
 0x5ef   :  { %v1598_v17 = vpop.f32.mrb[89].mxu0  ;;  %2784 = vmatmul.mubr.msk.bf16.gmra.mrb[4].mxu1 %vm230_vm1, %v1648_v34  ;;  %2800 = vmatpush3.bf16.msra.mxu0 %v1647_v14  ;;  %v1639_v48 = vsub.f32 %v2771_v52, %v3518_v63  ;;  %v3705_v52 = vld [vmem:[%s3836_s3] ss:$0 sm:$0xff] }
 0x5f0   :  { %v2772_v16 = vpop.f32.mrb[90].mxu0  ;;  %2801 = vmatprep.subr.bf16.mxu0 %v1648_v34  ;;  %v1637_v51 = vsub.f32 %v1598_v17, %v3512_v59 }
 0x5f1   :  { %v1640_v53 = vsub.f32 %v2772_v16, %v3509_v58  ;;  %v1601_v49 = vpop.f32.mrb[91].mxu0 }
 0x5f2   :  { %v1638_v46 = vsub.f32 %v1601_v49, %v3515_v61 }
 0x5f3   :  { %v1650_v3 = vpack.c.bf16 %v1640_v53, %v1639_v48  ;;  %2802 = vmatpush3.bf16.msra.mxu0 %v1648_v34 }
 0x5f4   :  { %v1649_v62 = vpack.c.bf16 %v1638_v46, %v1637_v51 }
 0x5f6   :  { %v2775_v20 = vpop.f32.mrb[92].mxu0  ;;  %2787 = vmatprep.mubr.msk.bf16.mxu1 %vm230_vm1, %v1649_v62  ;;  %2803 = vmatprep.subr.bf16.mxu0 %v1649_v62 }
 0x5f7   :  { %v1614_v22 = vpop.f32.mrb[93].mxu0  ;;  %2788 = vmatmul.mubr.msk.bf16.gmra.mrb[8].mxu1 %vm230_vm1, %v1650_v3  ;;  %2804 = vmatpush3.bf16.msra.mxu0 %v1649_v62  ;;  %v1643_v58 = vsub.f32 %v2775_v20, %v3536_v45 }
 0x5f8   :  { %v2776_v23 = vpop.f32.mrb[94].mxu0  ;;  %2805 = vmatprep.subr.bf16.mxu0 %v1650_v3  ;;  %v1641_v61 = vsub.f32 %v1614_v22, %v3530_v43 }
 0x5f9   :  { %v1644_v63 = vsub.f32 %v2776_v23, %v3527_v36  ;;  %v1617_v59 = vpop.f32.mrb[95].mxu0 }
 0x5fa   :  { %v1642_v15 = vsub.f32 %v1617_v59, %v3533_v44 }
 0x5fb   :  { %v1652_v21 = vpack.c.bf16 %v1644_v63, %v1643_v58  ;;  %2806 = vmatpush3.bf16.msra.mxu0 %v1650_v3 }
 0x5fc   :  { %v1651_v11 = vpack.c.bf16 %v1642_v15, %v1641_v61 }
 0x5fe   :  { %2791 = vmatprep.mubr.msk.bf16.mxu1 %vm230_vm1, %v1651_v11  ;;  %2807 = vmatprep.subr.bf16.mxu0 %v1651_v11 }
 0x5ff   :  { %2792 = vmatmul.mubr.msk.bf16.gmra.mrb[12].mxu1 %vm230_vm1, %v1652_v21  ;;  %2808 = vmatpush3.bf16.msra.mxu0 %v1651_v11 }
 0x600   :  { %2809 = vmatprep.subr.bf16.mxu0 %v1652_v21 }
 0x603   :  { %2810 = vmatpush3.bf16.msra.mxu0 %v1652_v21 }
 0x606   :  { %2812 = vmatmul.mubr.bf16.vlgmr.msra.gmra.mrb[96].mxu0 %v3166_v25 }
 0x607   :  { %2815 = vmatprep.mubr.bf16.mxu0 %v3172_v26 }
 0x60e   :  { %2816 = vmatmul.mubr.bf16.gmra.mrb[100].mxu0 %v3179_v27 }
 0x60f   :  { %2819 = vmatprep.mubr.bf16.mxu0 %v3184_v28 }
 0x616   :  { %2820 = vmatmul.mubr.bf16.gmra.mrb[104].mxu0 %v3191_v29 }
 0x617   :  { %2823 = vmatprep.mubr.bf16.mxu0 %v3196_v30 }
 0x61e   :  { %2824 = vmatmul.mubr.bf16.gmra.mrb[108].mxu0 %v3203_v31 }
 0x6d9   :  { %v2813_v36 = vpop.f32.mrb[96].mxu0 }
 0x6da   :  { %v1829_v43 = vpop.f32.mrb[97].mxu0  ;;  %v1894_v45 = vsub.f32 %v2813_v36, %v3567_v50 }
 0x6db   :  { %v2814_v44 = vpop.f32.mrb[98].mxu0  ;;  %v1892_v26 = vsub.f32 %v1829_v43, %v3561_v18 }
 0x6dc   :  { %v1895_v19 = vsub.f32 %v2814_v44, %v3558_v47  ;;  %v1832_v25 = vpop.f32.mrb[99].mxu0 }
 0x6dd   :  { %v1893_v27 = vsub.f32 %v1832_v25, %v3564_v24 }
 0x6de   :  { %v1909_v55 = vpack.c.bf16 %v1895_v19, %v1894_v45 }
 0x6df   :  { %v1908_v28 = vpack.c.bf16 %v1893_v27, %v1892_v26 }
 0x6e1   :  { %v2817_v4 = vpop.f32.mrb[100].mxu0  ;;  %2829 = vmatprep.mubr.msk.bf16.mxu1 %vm230_vm1, %v1908_v28 }
 0x6e2   :  { %v1845_v29 = vpop.f32.mrb[101].mxu0  ;;  %2830 = vmatmul.mubr.msk.bf16.vlgmr.msra.gmra.mrb[0].mxu1 %vm230_vm1, %v1909_v55  ;;  %v1898_v31 = vsub.f32 %v2817_v4, %v3585_v60 }
 0x6e3   :  { %v2818_v30 = vpop.f32.mrb[102].mxu0  ;;  %v1896_v47 = vsub.f32 %v1845_v29, %v3579_v1 }
 0x6e4   :  { %v1899_v50 = vsub.f32 %v2818_v30, %v3576_v0  ;;  %v1848_v2 = vpop.f32.mrb[103].mxu0 }
 0x6e5   :  { %v1897_v18 = vsub.f32 %v1848_v2, %v3582_v57 }
 0x6e6   :  { %v1911_v54 = vpack.c.bf16 %v1899_v50, %v1898_v31 }
 0x6e7   :  { %v1910_v24 = vpack.c.bf16 %v1897_v18, %v1896_v47 }
 0x6e9   :  { %v2821_v56 = vpop.f32.mrb[104].mxu0  ;;  %2833 = vmatprep.mubr.msk.bf16.mxu1 %vm230_vm1, %v1910_v24 }
 0x6ea   :  { %v1861_v37 = vpop.f32.mrb[105].mxu0  ;;  %2834 = vmatmul.mubr.msk.bf16.gmra.mrb[4].mxu1 %vm230_vm1, %v1911_v54  ;;  %v1902_v10 = vsub.f32 %v2821_v56, %v3603_v39 }
 0x6eb   :  { %v2822_v41 = vpop.f32.mrb[106].mxu0  ;;  %v1900_v0 = vsub.f32 %v1861_v37, %v3597_v7 }
 0x6ec   :  { %v1903_v60 = vsub.f32 %v2822_v41, %v3594_v6  ;;  %v1864_v42 = vpop.f32.mrb[107].mxu0 }
 0x6ed   :  { %v1901_v1 = vsub.f32 %v1864_v42, %v3600_v35 }
 0x6ee   :  { %v1913_v33 = vpack.c.bf16 %v1903_v60, %v1902_v10 }
 0x6ef   :  { %v1912_v57 = vpack.c.bf16 %v1901_v1, %v1900_v0 }
 0x6f1   :  { %v2825_v38 = vpop.f32.mrb[108].mxu0  ;;  %2837 = vmatprep.mubr.msk.bf16.mxu1 %vm230_vm1, %v1912_v57 }
 0x6f2   :  { %v1877_v40 = vpop.f32.mrb[109].mxu0  ;;  %2838 = vmatmul.mubr.msk.bf16.gmra.mrb[8].mxu1 %vm230_vm1, %v1913_v33  ;;  %v1906_v32 = vsub.f32 %v2825_v38, %v3621_v12 }
 0x6f3   :  { %v2826_v8 = vpop.f32.mrb[110].mxu0  ;;  %v1904_v6 = vsub.f32 %v1877_v40, %v3615_v5 }
 0x6f4   :  { %v1907_v39 = vsub.f32 %v2826_v8, %v3612_v13  ;;  %v1880_v34 = vpop.f32.mrb[111].mxu0 }
 0x6f5   :  { %v1905_v7 = vsub.f32 %v1880_v34, %v3618_v9 }
 0x6f6   :  { %v1915_v14 = vpack.c.bf16 %v1907_v39, %v1906_v32 }
 0x6f7   :  { %v1914_v35 = vpack.c.bf16 %v1905_v7, %v1904_v6 }
 0x6f9   :  { %2841 = vmatprep.mubr.msk.bf16.mxu1 %vm230_vm1, %v1914_v35 }
 0x6fa   :  { %2842 = vmatmul.mubr.msk.bf16.gmra.mrb[12].mxu1 %vm230_vm1, %v1915_v14 }
 0x7b5   :  { %v2831_v17 = vpop.f32.mrb[0].mxu1 }
 0x7b6   :  { %v2067_v12 = vadd.f32 %v2831_v17, %v3705_v52  ;;  %v1979_v13 = vpop.f32.mrb[1].mxu1 }
 0x7b7   :  { %v2065_v16 = vadd.f32 %v3705_v52, %v1979_v13  ;;  %v2832_v5 = vpop.f32.mrb[2].mxu1 }
 0x7b8   :  { %v2099_v48 = vmin.f32 %v2067_v12, 0.0  ;;  %v2068_v9 = vadd.f32 %v2832_v5, %v3705_v52  ;;  %v1982_v53 = vpop.f32.mrb[3].mxu1  ;;  %vm2083_vm2 = vcmp.gt.f32.partialorder %v2067_v12, 0.0 }
 0x7b9   :  { %v2097_v49 = vmin.f32 %v2065_v16, 0.0  ;;  %v3711_v51 = vadd.f32 %v3705_v52, %v1982_v53  ;;  %vm2081_vm3 = vcmp.gt.f32.partialorder %v2065_v16, 0.0 }
 0x7ba   :  { %v2117_v46 = vmul.f32 1.442695, %v2099_v48  ;;  %v2100_v3 = vmin.f32 %v2068_v9, 0.0  ;;  %vm2084_vm4 = vcmp.gt.f32.partialorder %v2068_v9, 0.0 }
 0x7bb   :  { %v2113_v62 = vmul.f32 1.442695, %v2097_v49  ;;  %v2098_v20 = vmin.f32 %v3711_v51, 0.0  ;;  %vm2082_vm5 = vcmp.gt.f32.partialorder %v3711_v51, 0.0 }
 0x7bc   :  { %2973 = vpow2.f32 %v2117_v46  ;;  %v2119_v22 = vmul.f32 1.442695, %v2100_v3 }
 0x7bd   :  { %2975 = vpow2.f32 %v2113_v62  ;;  %v2115_v23 = vmul.f32 1.442695, %v2098_v20  ;;  %v2835_v58 = vpop.f32.mrb[4].mxu1 }
 0x7be   :  { %2977 = vpow2.f32 %v2119_v22  ;;  %v3715_v63 = vadd.f32 %v2835_v58, %v3705_v52  ;;  %v1995_v59 = vpop.f32.mrb[5].mxu1 }
 0x7bf   :  { %2979 = vpow2.f32 %v2115_v23  ;;  %v3718_v61 = vadd.f32 %v3705_v52, %v1995_v59  ;;  %v2836_v15 = vpop.f32.mrb[6].mxu1 }
 0x7c0   :  { %v2103_v21 = vmin.f32 %v3715_v63, 0.0  ;;  %v3722_v11 = vadd.f32 %v2836_v15, %v3705_v52  ;;  %v1998_v36 = vpop.f32.mrb[7].mxu1  ;;  %vm2087_vm6 = vcmp.gt.f32.partialorder %v3715_v63, 0.0 }
 0x7c1   :  { %v2101_v43 = vmin.f32 %v3718_v61, 0.0  ;;  %v3726_v44 = vadd.f32 %v3705_v52, %v1998_v36  ;;  %vm2085_vm7 = vcmp.gt.f32.partialorder %v3718_v61, 0.0 }
 0x7c2   :  { %v2125_v45 = vmul.f32 1.442695, %v2103_v21  ;;  %v2104_v19 = vmin.f32 %v3722_v11, 0.0  ;;  %vm2088_vm8 = vcmp.gt.f32.partialorder %v3722_v11, 0.0 }
 0x7c3   :  { %v2121_v25 = vmul.f32 1.442695, %v2101_v43  ;;  %v2102_v26 = vmin.f32 %v3726_v44, 0.0  ;;  %vm2086_vm9 = vcmp.gt.f32.partialorder %v3726_v44, 0.0 }
 0x7c4   :  { %2981 = vpow2.f32 %v2125_v45  ;;  %v2127_v27 = vmul.f32 1.442695, %v2104_v19 }
 0x7c5   :  { %2983 = vpow2.f32 %v2121_v25  ;;  %v2123_v55 = vmul.f32 1.442695, %v2102_v26  ;;  %v2839_v28 = vpop.f32.mrb[8].mxu1 }
 0x7c6   :  { %v2974_v4 = vpop.eup %2973  ;;  %2985 = vpow2.f32 %v2127_v27  ;;  %v3731_v29 = vadd.f32 %v2839_v28, %v3705_v52  ;;  %v2011_v30 = vpop.f32.mrb[9].mxu1 }
 0x7c7   :  { %v2976_v31 = vpop.eup %2975  ;;  %v2279_v50 = vadd.f32 -1.0, %v2974_v4  ;;  %2987 = vpow2.f32 %v2123_v55  ;;  %v3734_v2 = vadd.f32 %v3705_v52, %v2011_v30  ;;  %v2840_v47 = vpop.f32.mrb[10].mxu1 }
 0x7c8   :  { %v2978_v18 = vpop.eup %2977  ;;  %v2277_v54 = vadd.f32 -1.0, %v2976_v31  ;;  %v2107_v24 = vmin.f32 %v3731_v29, 0.0  ;;  %v3738_v56 = vadd.f32 %v2840_v47, %v3705_v52  ;;  %v2014_v37 = vpop.f32.mrb[11].mxu1  ;;  %vm2091_vm10 = vcmp.gt.f32.partialorder %v3731_v29, 0.0 }
 0x7c9   :  { %v2980_v41 = vpop.eup %2979  ;;  %v2163_v10 = vsel %vm2083_vm2, %v2067_v12, %v2279_v50  ;;  %v2280_v60 = vadd.f32 -1.0, %v2978_v18  ;;  %v2105_v42 = vmin.f32 %v3734_v2, 0.0  ;;  %v3750_v8 = vadd.f32 %v3705_v52, %v2014_v37 }
 0x7ca   :  { %2179 = vst [vmem:[%s3837_s4 + $0x10] sm:$0xff] %v2163_v10  ;;  %v2161_v0 = vsel %vm2081_vm3, %v2065_v16, %v2277_v54  ;;  %v2278_v1 = vadd.f32 -1.0, %v2980_v41  ;;  %v2133_v33 = vmul.f32 1.442695, %v2107_v24  ;;  %v2108_v40 = vmin.f32 %v3738_v56, 0.0 }
 0x7cb   :  { %2177 = vst [vmem:[%s3837_s4] sm:$0xff] %v2161_v0  ;;  %v2164_v57 = vsel %vm2084_vm4, %v2068_v9, %v2280_v60  ;;  %v2129_v38 = vmul.f32 1.442695, %v2105_v42  ;;  %v2106_v34 = vmin.f32 %v3750_v8, 0.0  ;;  %vm2089_vm11 = vcmp.gt.f32.partialorder %v3734_v2, 0.0 }
 0x7cc   :  { %2180 = vst [vmem:[%s3837_s4 + $0x18] sm:$0xff] %v2164_v57  ;;  %v2162_v32 = vsel %vm2082_vm5, %v3711_v51, %v2278_v1  ;;  %2989 = vpow2.f32 %v2133_v33  ;;  %v2135_v39 = vmul.f32 1.442695, %v2108_v40  ;;  %vm2092_vm12 = vcmp.gt.f32.partialorder %v3738_v56, 0.0 }
 0x7cd   :  { %2178 = vst [vmem:[%s3837_s4 + $0x8] sm:$0xff] %v2162_v32  ;;  %2991 = vpow2.f32 %v2129_v38  ;;  %v2843_v6 = vpop.f32.mrb[12].mxu1  ;;  %v2131_v13 = vmul.f32 1.442695, %v2106_v34  ;;  %vm2090_vm13 = vcmp.gt.f32.partialorder %v3750_v8, 0.0 }
 0x7ce   :  { %v2982_v7 = vpop.eup %2981  ;;  %v3762_v14 = vadd.f32 %v2843_v6, %v3705_v52  ;;  %v2027_v35 = vpop.f32.mrb[13].mxu1  ;;  %2993 = vpow2.f32 %v2135_v39 }
 0x7cf   :  { %v2984_v17 = vpop.eup %2983  ;;  %v2283_v12 = vadd.f32 -1.0, %v2982_v7  ;;  %v3765_v16 = vadd.f32 %v3705_v52, %v2027_v35  ;;  %v2844_v5 = vpop.f32.mrb[14].mxu1  ;;  %2995 = vpow2.f32 %v2131_v13 }
 0x7d0   :  { %v2986_v48 = vpop.eup %2985  ;;  %v2281_v9 = vadd.f32 -1.0, %v2984_v17  ;;  %v2111_v53 = vmin.f32 %v3762_v14, 0.0  ;;  %v3770_v49 = vadd.f32 %v2844_v5, %v3705_v52  ;;  %v2030_v51 = vpop.f32.mrb[15].mxu1  ;;  %vm2095_vm14 = vcmp.gt.f32.partialorder %v3762_v14, 0.0 }
 0x7d1   :  { %v2988_v46 = vpop.eup %2987  ;;  %v2167_v3 = vsel %vm2087_vm6, %v3715_v63, %v2283_v12  ;;  %v2284_v62 = vadd.f32 -1.0, %v2986_v48  ;;  %v2109_v58 = vmin.f32 %v3765_v16, 0.0  ;;  %v2078_v15 = vadd.f32 %v3705_v52, %v2030_v51 }
 0x7d2   :  { %2183 = vst [vmem:[%s3837_s4 + $0x30] sm:$0xff] %v2167_v3  ;;  %v2165_v20 = vsel %vm2085_vm7, %v3718_v61, %v2281_v9  ;;  %v2282_v22 = vadd.f32 -1.0, %v2988_v46  ;;  %v2141_v23 = vmul.f32 1.442695, %v2111_v53  ;;  %v2112_v59 = vmin.f32 %v3770_v49, 0.0 }
 0x7d3   :  { %2181 = vst [vmem:[%s3837_s4 + $0x20] sm:$0xff] %v2165_v20  ;;  %v2168_v63 = vsel %vm2088_vm8, %v3722_v11, %v2284_v62  ;;  %v2137_v21 = vmul.f32 1.442695, %v2109_v58  ;;  %v2110_v11 = vmin.f32 %v2078_v15, 0.0  ;;  %vm2093_vm15 = vcmp.gt.f32.partialorder %v3765_v16, 0.0 }
 0x7d4   :  { %2184 = vst [vmem:[%s3837_s4 + $0x38] sm:$0xff] %v2168_v63  ;;  %v2166_v61 = vsel %vm2086_vm9, %v3726_v44, %v2282_v22  ;;  %2997 = vpow2.f32 %v2141_v23  ;;  %v2143_v36 = vmul.f32 1.442695, %v2112_v59  ;;  %vm2096_vm0 = vcmp.gt.f32.partialorder %v3770_v49, 0.0 }
 0x7d5   :  { %2182 = vst [vmem:[%s3837_s4 + $0x28] sm:$0xff] %v2166_v61  ;;  %2999 = vpow2.f32 %v2137_v21  ;;  %v2139_v52 = vmul.f32 1.442695, %v2110_v11  ;;  %vm2094_vm1 = vcmp.gt.f32.partialorder %v2078_v15, 0.0 }
 0x7d6   :  { %v2990_v43 = vpop.eup %2989  ;;  %3001 = vpow2.f32 %v2143_v36 }
 0x7d7   :  { %v2992_v45 = vpop.eup %2991  ;;  %v2287_v19 = vadd.f32 -1.0, %v2990_v43  ;;  %3003 = vpow2.f32 %v2139_v52 }
 0x7d8   :  { %v2285_v25 = vadd.f32 -1.0, %v2992_v45  ;;  %v2994_v26 = vpop.eup %2993 }
 0x7d9   :  { %v2171_v44 = vsel %vm2091_vm10, %v3731_v29, %v2287_v19  ;;  %v2288_v55 = vadd.f32 -1.0, %v2994_v26  ;;  %v2996_v28 = vpop.eup %2995 }
 0x7da   :  { %2187 = vst [vmem:[%s3837_s4 + $0x50] sm:$0xff] %v2171_v44  ;;  %v2169_v27 = vsel %vm2089_vm11, %v3734_v2, %v2285_v25  ;;  %v2286_v29 = vadd.f32 -1.0, %v2996_v28 }
 0x7db   :  { %2185 = vst [vmem:[%s3837_s4 + $0x40] sm:$0xff] %v2169_v27  ;;  %v2172_v4 = vsel %vm2092_vm12, %v3738_v56, %v2288_v55 }
 0x7dc   :  { %2188 = vst [vmem:[%s3837_s4 + $0x58] sm:$0xff] %v2172_v4  ;;  %v2170_v31 = vsel %vm2090_vm13, %v3750_v8, %v2286_v29 }
 0x7dd   :  { %2186 = vst [vmem:[%s3837_s4 + $0x48] sm:$0xff] %v2170_v31 }
 0x7de   :  { %v2998_v30 = vpop.eup %2997 }
 0x7df   :  { %v2291_v50 = vadd.f32 -1.0, %v2998_v30  ;;  %v3000_v2 = vpop.eup %2999 }
 0x7e0   :  { %v3002_v47 = vpop.eup %3001  ;;  %v2289_v54 = vadd.f32 -1.0, %v3000_v2 }
 0x7e1   :  { %v2175_v18 = vsel %vm2095_vm14, %v3762_v14, %v2291_v50  ;;  %v2292_v24 = vadd.f32 -1.0, %v3002_v47  ;;  %v3004_v56 = vpop.eup %3003 }
 0x7e2   :  { %2191 = vst [vmem:[%s3837_s4 + $0x70] sm:$0xff] %v2175_v18  ;;  %v2173_v37 = vsel %vm2093_vm15, %v3765_v16, %v2289_v54  ;;  %v2290_v10 = vadd.f32 -1.0, %v3004_v56 }
 0x7e3   :  { %2189 = vst [vmem:[%s3837_s4 + $0x60] sm:$0xff] %v2173_v37  ;;  %v2176_v41 = vsel %vm2096_vm0, %v3770_v49, %v2292_v24 }
 0x7e4   :  { %2192 = vst [vmem:[%s3837_s4 + $0x78] sm:$0xff] %v2176_v41  ;;  %v2174_v60 = vsel %vm2094_vm1, %v2078_v15, %v2290_v10 }
 0x7e5   :  { %2190 = vst [vmem:[%s3837_s4 + $0x68] sm:$0xff] %v2174_v60 }

</bundles_post_ra>
